<compile_context>
chip_gen: v7x
topology: tpu7x:2x2x1
jax: 0.10.0
libtpu: 0.0.40
codegen_flags: <defaults>
</compile_context>

<pallas_src>
import functools

import jax
import jax.numpy as jnp
from jax.experimental import pallas as pl
from jax.experimental.pallas import tpu as pltpu

LEAKY_SLOPE = 0.01        # torch.nn.LeakyReLU default negative_slope
_LANE = 128
_SUBLANE = 8


def _leaky_relu(x):
    return jnp.where(x > 0, x, LEAKY_SLOPE * x)


def _round_up(n, m):
    return (n + m - 1) // m * m


def _vmem_budget_bytes():
    """Generation-specific VMEM budget (bytes) for tile sizing / vmem limit."""
    try:
        kind = jax.devices()[0].device_kind.lower()
    except Exception:
        kind = ""
    if "v7" in kind:                      # 64 MiB/TC parts: leave scratch headroom
        return 40 * 1024 * 1024
    if "v5" in kind or "v6" in kind:      # 128 MiB VMEM parts
        return 96 * 1024 * 1024
    return 48 * 1024 * 1024               # unknown / older parts: conservative


# ---------------------------------------------------------------------------
# Path A: batch-in-lanes (VPU) kernel for small layers (D < 128 and H < 128).
# ---------------------------------------------------------------------------
def _mlp_value_lanes_kernel(xt_ref, w1t_ref, b1_ref, w2t_ref, b2_ref, w3_ref,
                            o_ref):
    # xt_ref : (D, TB) f32  -- batch on the 128-lane axis
    # w1t_ref: (H, D)  f32  -- W1^T;  w2t_ref: (H, H) f32 -- W2^T
    # b1/b2/w3: (H, 1) f32 columns
    xt = xt_ref[...]
    w1t = w1t_ref[...]
    w2t = w2t_ref[...]
    d_in = w1t.shape[1]
    hidden = w1t.shape[0]

    # Layer 1: h1[h, t] = sum_d W1^T[h, d] * x^T[d, t] + b1[h]  (VPU MACs).
    acc = w1t[:, 0:1] * xt[0:1, :]
    for d in range(1, d_in):
        acc = acc + w1t[:, d:d + 1] * xt[d:d + 1, :]
    h1 = _leaky_relu(acc + b1_ref[...])                       # (H, TB)

    # Layer 2: h2[h, t] = sum_j W2^T[h, j] * h1[j, t] + b2[h]
    acc = w2t[:, 0:1] * h1[0:1, :]
    for j in range(1, hidden):
        acc = acc + w2t[:, j:j + 1] * h1[j:j + 1, :]
    h2 = _leaky_relu(acc + b2_ref[...])                       # (H, TB)

    # Head Linear(H -> 1, bias=False): sublane reduce -> lane-dense (1, TB) row.
    o_ref[...] = jnp.sum(w3_ref[...] * h2, axis=0, keepdims=True)


# ---------------------------------------------------------------------------
# Path B: MXU kernel for larger layers (H >= 128 or D >= 128).
# ---------------------------------------------------------------------------
def _mlp_value_mxu_kernel(x_ref, w1_ref, b1_ref, w2_ref, b2_ref, w3_ref, o_ref):
    # x is streamed in its stored dtype and cast to the matmul dtype in-kernel
    # (no wrapper-side cast => no extra HBM pass over x).
    cdt = w1_ref.dtype
    x = x_ref[...].astype(cdt)
    h1 = jnp.dot(x, w1_ref[...], preferred_element_type=jnp.float32)
    h1 = _leaky_relu(h1 + b1_ref[...])                        # f32 VPU
    h2 = jnp.dot(h1.astype(cdt), w2_ref[...],
                 preferred_element_type=jnp.float32)
    h2 = _leaky_relu(h2 + b2_ref[...])                        # f32 VPU
    # Linear(H -> 1, bias=False): VPU multiply + lane reduce (MXU stays free).
    o_ref[...] = jnp.sum(h2 * w3_ref[...], axis=-1, keepdims=True)


# ---------------------------------------------------------------------------
# Tile sizing with layout-padded VMEM accounting.
# ---------------------------------------------------------------------------
def _lanes_footprint(tb, d_in, hidden):
    pd = _round_up(d_in, _SUBLANE)
    ph = _round_up(hidden, _SUBLANE)
    f = 2 * pd * tb * 4                          # double-buffered x^T tile
    f += 2 * _SUBLANE * tb * 4                   # double-buffered (1, TB) out row
    f += 2 * 4 * (ph * _round_up(d_in, _LANE)    # resident params (2 buffers)
                  + ph * _round_up(hidden, _LANE)
                  + 3 * ph * _LANE)
    f += 4 * ph * tb * 4                         # h1 / h2 / accumulator values
    return f


def _mxu_footprint(tb, d_in, hidden, x_bytes, w_bytes):
    pd = _round_up(d_in, _LANE)
    ph = _round_up(hidden, _LANE)
    f = 2 * tb * pd * x_bytes                    # double-buffered x tile
    f += 2 * tb * _LANE * 4                      # (TB, 1) out block pads to 128 lanes
    f += 2 * w_bytes * (_round_up(d_in, _SUBLANE) * ph
                        + _round_up(hidden, _SUBLANE) * ph
                        + 3 * _SUBLANE * ph)
    f += 3 * tb * ph * 4                         # h1, h2 (+ cast copy) values
    return f


def _pick_tile(batch, block_b, unit, footprint_fn, budget):
    tb = _round_up(max(unit, min(block_b, batch)), unit)
    if batch > unit:
        # Prefer >= 2 grid steps so both of v7x's TensorCores get work; the
        # extra ~0.35us step is negligible on single-TC v5e/v6e.
        tb = min(tb, max(unit, _round_up(pl.cdiv(batch, 2), unit)))
    while tb > unit and footprint_fn(tb) > budget:
        tb = max(unit, _round_up(tb // 2, unit))
    return tb


# ---------------------------------------------------------------------------
# Wrapper.
# ---------------------------------------------------------------------------
@functools.partial(jax.jit, static_argnames=("block_b", "matmul_dtype"))
def mlp_value_forward(x, w1, b1, w2, b2, w3, *, block_b=8192,
                      matmul_dtype=jnp.bfloat16):
    """MLPValueModule.forward.

    x : (B, obs_dim); w1: (obs_dim, H); b1: (H,); w2: (H, H); b2: (H,); w3: (H,)
    Returns (B,) float32 values.  matmul_dtype only affects the MXU path
    (H or obs_dim >= 128); the small-layer VPU path runs in float32.
    """
    orig_b, d_in = x.shape
    hidden = w1.shape[1]
    budget = _vmem_budget_bytes()

    use_lanes = d_in < _LANE and hidden < _LANE
    unit = _LANE if use_lanes else _SUBLANE

    # Pad only when the batch is smaller than one minimum tile (trivial cost);
    # otherwise ragged batches use the cdiv grid's partial last block.
    batch = max(orig_b, unit)
    if batch != orig_b:
        x = jnp.pad(x, ((0, batch - orig_b), (0, 0)))

    if use_lanes:
        tb = _pick_tile(batch, block_b, unit,
                        lambda t: _lanes_footprint(t, d_in, hidden), budget)
        grid = (pl.cdiv(batch, tb),)
        xt = x.astype(jnp.float32).T                     # (D, B): batch on lanes
        w1t = w1.astype(jnp.float32).T                   # (H, D)
        w2t = w2.astype(jnp.float32).T                   # (H, H)
        b1c = b1.astype(jnp.float32).reshape(hidden, 1)
        b2c = b2.astype(jnp.float32).reshape(hidden, 1)
        w3c = w3.astype(jnp.float32).reshape(hidden, 1)
        out = pl.pallas_call(
            _mlp_value_lanes_kernel,
            out_shape=jax.ShapeDtypeStruct((1, batch), jnp.float32),
            grid_spec=pltpu.PrefetchScalarGridSpec(
                num_scalar_prefetch=0,
                grid=grid,
                in_specs=[
                    pl.BlockSpec((d_in, tb), lambda i: (0, i)),      # streamed x^T
                    pl.BlockSpec((hidden, d_in), lambda i: (0, 0)),  # resident params
                    pl.BlockSpec((hidden, 1), lambda i: (0, 0)),
                    pl.BlockSpec((hidden, hidden), lambda i: (0, 0)),
                    pl.BlockSpec((hidden, 1), lambda i: (0, 0)),
                    pl.BlockSpec((hidden, 1), lambda i: (0, 0)),
                ],
                out_specs=pl.BlockSpec((1, tb), lambda i: (0, i)),   # lane-dense
            ),
            compiler_params=pltpu.CompilerParams(
                dimension_semantics=("parallel",),
                vmem_limit_bytes=int(budget),
            ),
        )(xt, w1t, b1c, w2t, b2c, w3c)
        return out[0, :orig_b]

    # MXU path (H or obs_dim >= 128).
    w_bytes = jnp.finfo(matmul_dtype).bits // 8
    tb = _pick_tile(batch, block_b, unit,
                    lambda t: _mxu_footprint(t, d_in, hidden,
                                             x.dtype.itemsize, w_bytes),
                    budget)
    grid = (pl.cdiv(batch, tb),)
    w1d = w1.astype(matmul_dtype)                        # tiny one-time casts
    w2d = w2.astype(matmul_dtype)
    b1r = b1.astype(jnp.float32).reshape(1, hidden)
    b2r = b2.astype(jnp.float32).reshape(1, hidden)
    w3r = w3.astype(jnp.float32).reshape(1, hidden)
    out = pl.pallas_call(
        _mlp_value_mxu_kernel,
        out_shape=jax.ShapeDtypeStruct((batch, 1), jnp.float32),
        grid_spec=pltpu.PrefetchScalarGridSpec(
            num_scalar_prefetch=0,
            grid=grid,
            in_specs=[
                pl.BlockSpec((tb, d_in), lambda i: (i, 0)),          # streamed x
                pl.BlockSpec((d_in, hidden), lambda i: (0, 0)),      # resident params
                pl.BlockSpec((1, hidden), lambda i: (0, 0)),
                pl.BlockSpec((hidden, hidden), lambda i: (0, 0)),
                pl.BlockSpec((1, hidden), lambda i: (0, 0)),
                pl.BlockSpec((1, hidden), lambda i: (0, 0)),
            ],
            out_specs=pl.BlockSpec((tb, 1), lambda i: (i, 0)),
        ),
        compiler_params=pltpu.CompilerParams(
            dimension_semantics=("parallel",),
            vmem_limit_bytes=int(budget),
        ),
    )(x, w1d, b1r, w2d, b2r, w3r)
    return out[:orig_b, 0]


# ---------------------------------------------------------------------------
# Parameter init (matches the PyTorch module) and pure-JAX references.
# ---------------------------------------------------------------------------
def init_params(key, obs_dim, hidden):
    """Linear layers: uniform(-1/sqrt(fan_in), 1/sqrt(fan_in)); head zero-init."""
    k1, k2, k3, k4 = jax.random.split(key, 4)
    lim1 = 1.0 / float(obs_dim) ** 0.5
    lim2 = 1.0 / float(hidden) ** 0.5
    w1 = jax.random.uniform(k1, (obs_dim, hidden), jnp.float32, -lim1, lim1)
    b1 = jax.random.uniform(k2, (hidden,), jnp.float32, -lim1, lim1)
    w2 = jax.random.uniform(k3, (hidden, hidden), jnp.float32, -lim2, lim2)
    b2 = jax.random.uniform(k4, (hidden,), jnp.float32, -lim2, lim2)
    w3 = jnp.zeros((hidden,), jnp.float32)               # last_layer.weight.zero_()
    return w1, b1, w2, b2, w3


def reference_forward(x, w1, b1, w2, b2, w3):
    h1 = _leaky_relu(x @ w1 + b1)
    h2 = _leaky_relu(h1 @ w2 + b2)
    return h2 @ w3


def reference_forward_cast(x, w1, b1, w2, b2, w3, matmul_dtype):
    h1 = jnp.dot(x.astype(matmul_dtype), w1.astype(matmul_dtype),
                 preferred_element_type=jnp.float32) + b1
    h1 = _leaky_relu(h1)
    h2 = jnp.dot(h1.astype(matmul_dtype), w2.astype(matmul_dtype),
                 preferred_element_type=jnp.float32) + b2
    h2 = _leaky_relu(h2)
    return h2 @ w3


if __name__ == "__main__":
    key = jax.random.PRNGKey(0)
    kx, kp, kw3, kx2, kpl, kw3l, kxl = jax.random.split(key, 7)

    # Production-like small layers -> batch-in-lanes VPU path.
    B, OBS_DIM, HIDDEN = 37, 16, 32
    x = jax.random.normal(kx, (B, OBS_DIM), jnp.float32)
    w1, b1, w2, b2, w3_zero = init_params(kp, OBS_DIM, HIDDEN)

    # 1) Module semantics: zero-initialized final layer -> output exactly 0.
    out_zero = jax.block_until_ready(mlp_value_forward(x, w1, b1, w2, b2, w3_zero))
    assert out_zero.shape == (B,), out_zero.shape
    assert jnp.all(out_zero == 0.0), out_zero

    # 2) Non-zero head, small ragged batch (single tile) and larger ragged batch
    #    (3 grid steps with a partial tail block, no wrapper jnp.pad).
    w3 = jax.random.uniform(kw3, (HIDDEN,), jnp.float32, -0.5, 0.5)
    out1 = jax.block_until_ready(mlp_value_forward(x, w1, b1, w2, b2, w3))
    ref1 = reference_forward(x, w1, b1, w2, b2, w3)
    assert out1.shape == (B,), out1.shape
    assert jnp.allclose(out1, ref1, atol=1e-4, rtol=1e-4), (out1, ref1)

    B2 = 300
    x2 = jax.random.normal(kx2, (B2, OBS_DIM), jnp.float32)
    out2 = jax.block_until_ready(
        mlp_value_forward(x2, w1, b1, w2, b2, w3, block_b=128))
    ref2 = reference_forward(x2, w1, b1, w2, b2, w3)
    assert out2.shape == (B2,), out2.shape
    assert jnp.allclose(out2, ref2, atol=1e-4, rtol=1e-4), (out2, ref2)

    # 3) Larger hidden (>=128) -> MXU path: f32 (tight) and default bf16 inputs
    #    (compared against a reference applying the same input casts).
    HID_L = 128
    w1l, b1l, w2l, b2l, _ = init_params(kpl, OBS_DIM, HID_L)
    w3l = jax.random.uniform(kw3l, (HID_L,), jnp.float32, -0.5, 0.5)
    xl = jax.random.normal(kxl, (64, OBS_DIM), jnp.float32)
    out_f32 = jax.block_until_ready(
        mlp_value_forward(xl, w1l, b1l, w2l, b2l, w3l, matmul_dtype=jnp.float32))
    refl = reference_forward(xl, w1l, b1l, w2l, b2l, w3l)
    assert jnp.allclose(out_f32, refl, atol=1e-4, rtol=1e-4), (out_f32, refl)

    out_bf16 = jax.block_until_ready(
        mlp_value_forward(xl, w1l, b1l, w2l, b2l, w3l))   # default bf16 MXU inputs
    ref_bf16 = reference_forward_cast(xl, w1l, b1l, w2l, b2l, w3l, jnp.bfloat16)
    assert jnp.allclose(out_bf16, ref_bf16, atol=2e-3, rtol=2e-3), (out_bf16, ref_bf16)

    print("KERNEL_OK")
</pallas_src>

<mosaic_0001>
module attributes {stable_mosaic.version = 11 : i64} {
  func.func @_mlp_value_lanes_kernel(%arg0: i32, %arg1: memref<16x128xf32, #tpu.memory_space<vmem>>, %arg2: memref<32x16xf32, #tpu.memory_space<vmem>>, %arg3: memref<32x1xf32, #tpu.memory_space<vmem>>, %arg4: memref<32x32xf32, #tpu.memory_space<vmem>>, %arg5: memref<32x1xf32, #tpu.memory_space<vmem>>, %arg6: memref<32x1xf32, #tpu.memory_space<vmem>>, %arg7: memref<1x128xf32, #tpu.memory_space<vmem>>) attributes {dimension_semantics = [#tpu.dimension_semantics<parallel>], iteration_bounds = array<i64: 1>, scalar_prefetch = 0 : i64, scratch_operands = 0 : i64, tpu.core_type = #tpu.core_type<tc>, window_params = [{transform_indices = @transform_0, window_bounds = array<i64: 16, 128>}, {pipeline_mode = #tpu.pipeline_mode<synchronous>, transform_indices = @transform_1, window_bounds = array<i64: 32, 16>}, {pipeline_mode = #tpu.pipeline_mode<synchronous>, transform_indices = @transform_2, window_bounds = array<i64: 32, 1>}, {pipeline_mode = #tpu.pipeline_mode<synchronous>, transform_indices = @transform_3, window_bounds = array<i64: 32, 32>}, {pipeline_mode = #tpu.pipeline_mode<synchronous>, transform_indices = @transform_4, window_bounds = array<i64: 32, 1>}, {pipeline_mode = #tpu.pipeline_mode<synchronous>, transform_indices = @transform_5, window_bounds = array<i64: 32, 1>}, {transform_indices = @transform_6, window_bounds = array<i64: 1, 128>}]} {
    %c0 = arith.constant 0 : index
    %c0_0 = arith.constant 0 : index
    %0 = vector.load %arg1[%c0, %c0_0] : memref<16x128xf32, #tpu.memory_space<vmem>>, vector<16x128xf32>
    %c0_1 = arith.constant 0 : index
    %c0_2 = arith.constant 0 : index
    %1 = vector.load %arg2[%c0_1, %c0_2] : memref<32x16xf32, #tpu.memory_space<vmem>>, vector<32x16xf32>
    %c0_3 = arith.constant 0 : index
    %c0_4 = arith.constant 0 : index
    %2 = vector.load %arg4[%c0_3, %c0_4] : memref<32x32xf32, #tpu.memory_space<vmem>>, vector<32x32xf32>
    %3 = vector.extract_strided_slice %1 {offsets = [0, 0], sizes = [32, 1], strides = [1, 1]} : vector<32x16xf32> to vector<32x1xf32>
    %4 = vector.extract_strided_slice %0 {offsets = [0, 0], sizes = [1, 128], strides = [1, 1]} : vector<16x128xf32> to vector<1x128xf32>
    %5 = vector.broadcast %3 : vector<32x1xf32> to vector<32x128xf32>
    %6 = vector.broadcast %4 : vector<1x128xf32> to vector<32x128xf32>
    %7 = arith.mulf %5, %6 : vector<32x128xf32>
    %8 = vector.extract_strided_slice %1 {offsets = [0, 1], sizes = [32, 1], strides = [1, 1]} : vector<32x16xf32> to vector<32x1xf32>
    %9 = vector.extract_strided_slice %0 {offsets = [1, 0], sizes = [1, 128], strides = [1, 1]} : vector<16x128xf32> to vector<1x128xf32>
    %10 = vector.broadcast %8 : vector<32x1xf32> to vector<32x128xf32>
    %11 = vector.broadcast %9 : vector<1x128xf32> to vector<32x128xf32>
    %12 = arith.mulf %10, %11 : vector<32x128xf32>
    %13 = arith.addf %7, %12 : vector<32x128xf32>
    %14 = vector.extract_strided_slice %1 {offsets = [0, 2], sizes = [32, 1], strides = [1, 1]} : vector<32x16xf32> to vector<32x1xf32>
    %15 = vector.extract_strided_slice %0 {offsets = [2, 0], sizes = [1, 128], strides = [1, 1]} : vector<16x128xf32> to vector<1x128xf32>
    %16 = vector.broadcast %14 : vector<32x1xf32> to vector<32x128xf32>
    %17 = vector.broadcast %15 : vector<1x128xf32> to vector<32x128xf32>
    %18 = arith.mulf %16, %17 : vector<32x128xf32>
    %19 = arith.addf %13, %18 : vector<32x128xf32>
    %20 = vector.extract_strided_slice %1 {offsets = [0, 3], sizes = [32, 1], strides = [1, 1]} : vector<32x16xf32> to vector<32x1xf32>
    %21 = vector.extract_strided_slice %0 {offsets = [3, 0], sizes = [1, 128], strides = [1, 1]} : vector<16x128xf32> to vector<1x128xf32>
    %22 = vector.broadcast %20 : vector<32x1xf32> to vector<32x128xf32>
    %23 = vector.broadcast %21 : vector<1x128xf32> to vector<32x128xf32>
    %24 = arith.mulf %22, %23 : vector<32x128xf32>
    %25 = arith.addf %19, %24 : vector<32x128xf32>
    %26 = vector.extract_strided_slice %1 {offsets = [0, 4], sizes = [32, 1], strides = [1, 1]} : vector<32x16xf32> to vector<32x1xf32>
    %27 = vector.extract_strided_slice %0 {offsets = [4, 0], sizes = [1, 128], strides = [1, 1]} : vector<16x128xf32> to vector<1x128xf32>
    %28 = vector.broadcast %26 : vector<32x1xf32> to vector<32x128xf32>
    %29 = vector.broadcast %27 : vector<1x128xf32> to vector<32x128xf32>
    %30 = arith.mulf %28, %29 : vector<32x128xf32>
    %31 = arith.addf %25, %30 : vector<32x128xf32>
    %32 = vector.extract_strided_slice %1 {offsets = [0, 5], sizes = [32, 1], strides = [1, 1]} : vector<32x16xf32> to vector<32x1xf32>
    %33 = vector.extract_strided_slice %0 {offsets = [5, 0], sizes = [1, 128], strides = [1, 1]} : vector<16x128xf32> to vector<1x128xf32>
    %34 = vector.broadcast %32 : vector<32x1xf32> to vector<32x128xf32>
    %35 = vector.broadcast %33 : vector<1x128xf32> to vector<32x128xf32>
    %36 = arith.mulf %34, %35 : vector<32x128xf32>
    %37 = arith.addf %31, %36 : vector<32x128xf32>
    %38 = vector.extract_strided_slice %1 {offsets = [0, 6], sizes = [32, 1], strides = [1, 1]} : vector<32x16xf32> to vector<32x1xf32>
    %39 = vector.extract_strided_slice %0 {offsets = [6, 0], sizes = [1, 128], strides = [1, 1]} : vector<16x128xf32> to vector<1x128xf32>
    %40 = vector.broadcast %38 : vector<32x1xf32> to vector<32x128xf32>
    %41 = vector.broadcast %39 : vector<1x128xf32> to vector<32x128xf32>
    %42 = arith.mulf %40, %41 : vector<32x128xf32>
    %43 = arith.addf %37, %42 : vector<32x128xf32>
    %44 = vector.extract_strided_slice %1 {offsets = [0, 7], sizes = [32, 1], strides = [1, 1]} : vector<32x16xf32> to vector<32x1xf32>
    %45 = vector.extract_strided_slice %0 {offsets = [7, 0], sizes = [1, 128], strides = [1, 1]} : vector<16x128xf32> to vector<1x128xf32>
    %46 = vector.broadcast %44 : vector<32x1xf32> to vector<32x128xf32>
    %47 = vector.broadcast %45 : vector<1x128xf32> to vector<32x128xf32>
    %48 = arith.mulf %46, %47 : vector<32x128xf32>
    %49 = arith.addf %43, %48 : vector<32x128xf32>
    %50 = vector.extract_strided_slice %1 {offsets = [0, 8], sizes = [32, 1], strides = [1, 1]} : vector<32x16xf32> to vector<32x1xf32>
    %51 = vector.extract_strided_slice %0 {offsets = [8, 0], sizes = [1, 128], strides = [1, 1]} : vector<16x128xf32> to vector<1x128xf32>
    %52 = vector.broadcast %50 : vector<32x1xf32> to vector<32x128xf32>
    %53 = vector.broadcast %51 : vector<1x128xf32> to vector<32x128xf32>
    %54 = arith.mulf %52, %53 : vector<32x128xf32>
    %55 = arith.addf %49, %54 : vector<32x128xf32>
    %56 = vector.extract_strided_slice %1 {offsets = [0, 9], sizes = [32, 1], strides = [1, 1]} : vector<32x16xf32> to vector<32x1xf32>
    %57 = vector.extract_strided_slice %0 {offsets = [9, 0], sizes = [1, 128], strides = [1, 1]} : vector<16x128xf32> to vector<1x128xf32>
    %58 = vector.broadcast %56 : vector<32x1xf32> to vector<32x128xf32>
    %59 = vector.broadcast %57 : vector<1x128xf32> to vector<32x128xf32>
    %60 = arith.mulf %58, %59 : vector<32x128xf32>
    %61 = arith.addf %55, %60 : vector<32x128xf32>
    %62 = vector.extract_strided_slice %1 {offsets = [0, 10], sizes = [32, 1], strides = [1, 1]} : vector<32x16xf32> to vector<32x1xf32>
    %63 = vector.extract_strided_slice %0 {offsets = [10, 0], sizes = [1, 128], strides = [1, 1]} : vector<16x128xf32> to vector<1x128xf32>
    %64 = vector.broadcast %62 : vector<32x1xf32> to vector<32x128xf32>
    %65 = vector.broadcast %63 : vector<1x128xf32> to vector<32x128xf32>
    %66 = arith.mulf %64, %65 : vector<32x128xf32>
    %67 = arith.addf %61, %66 : vector<32x128xf32>
    %68 = vector.extract_strided_slice %1 {offsets = [0, 11], sizes = [32, 1], strides = [1, 1]} : vector<32x16xf32> to vector<32x1xf32>
    %69 = vector.extract_strided_slice %0 {offsets = [11, 0], sizes = [1, 128], strides = [1, 1]} : vector<16x128xf32> to vector<1x128xf32>
    %70 = vector.broadcast %68 : vector<32x1xf32> to vector<32x128xf32>
    %71 = vector.broadcast %69 : vector<1x128xf32> to vector<32x128xf32>
    %72 = arith.mulf %70, %71 : vector<32x128xf32>
    %73 = arith.addf %67, %72 : vector<32x128xf32>
    %74 = vector.extract_strided_slice %1 {offsets = [0, 12], sizes = [32, 1], strides = [1, 1]} : vector<32x16xf32> to vector<32x1xf32>
    %75 = vector.extract_strided_slice %0 {offsets = [12, 0], sizes = [1, 128], strides = [1, 1]} : vector<16x128xf32> to vector<1x128xf32>
    %76 = vector.broadcast %74 : vector<32x1xf32> to vector<32x128xf32>
    %77 = vector.broadcast %75 : vector<1x128xf32> to vector<32x128xf32>
    %78 = arith.mulf %76, %77 : vector<32x128xf32>
    %79 = arith.addf %73, %78 : vector<32x128xf32>
    %80 = vector.extract_strided_slice %1 {offsets = [0, 13], sizes = [32, 1], strides = [1, 1]} : vector<32x16xf32> to vector<32x1xf32>
    %81 = vector.extract_strided_slice %0 {offsets = [13, 0], sizes = [1, 128], strides = [1, 1]} : vector<16x128xf32> to vector<1x128xf32>
    %82 = vector.broadcast %80 : vector<32x1xf32> to vector<32x128xf32>
    %83 = vector.broadcast %81 : vector<1x128xf32> to vector<32x128xf32>
    %84 = arith.mulf %82, %83 : vector<32x128xf32>
    %85 = arith.addf %79, %84 : vector<32x128xf32>
    %86 = vector.extract_strided_slice %1 {offsets = [0, 14], sizes = [32, 1], strides = [1, 1]} : vector<32x16xf32> to vector<32x1xf32>
    %87 = vector.extract_strided_slice %0 {offsets = [14, 0], sizes = [1, 128], strides = [1, 1]} : vector<16x128xf32> to vector<1x128xf32>
    %88 = vector.broadcast %86 : vector<32x1xf32> to vector<32x128xf32>
    %89 = vector.broadcast %87 : vector<1x128xf32> to vector<32x128xf32>
    %90 = arith.mulf %88, %89 : vector<32x128xf32>
    %91 = arith.addf %85, %90 : vector<32x128xf32>
    %92 = vector.extract_strided_slice %1 {offsets = [0, 15], sizes = [32, 1], strides = [1, 1]} : vector<32x16xf32> to vector<32x1xf32>
    %93 = vector.extract_strided_slice %0 {offsets = [15, 0], sizes = [1, 128], strides = [1, 1]} : vector<16x128xf32> to vector<1x128xf32>
    %94 = vector.broadcast %92 : vector<32x1xf32> to vector<32x128xf32>
    %95 = vector.broadcast %93 : vector<1x128xf32> to vector<32x128xf32>
    %96 = arith.mulf %94, %95 : vector<32x128xf32>
    %97 = arith.addf %91, %96 : vector<32x128xf32>
    %c0_5 = arith.constant 0 : index
    %c0_6 = arith.constant 0 : index
    %98 = vector.load %arg3[%c0_5, %c0_6] : memref<32x1xf32, #tpu.memory_space<vmem>>, vector<32x1xf32>
    %99 = vector.broadcast %98 : vector<32x1xf32> to vector<32x128xf32>
    %100 = arith.addf %97, %99 : vector<32x128xf32>
    %cst = arith.constant 0.000000e+00 : f32
    %101 = vector.broadcast %cst : f32 to vector<32x128xf32>
    %102 = arith.cmpf ogt, %100, %101 : vector<32x128xf32>
    %cst_7 = arith.constant 0.00999999977 : f32
    %103 = vector.broadcast %cst_7 : f32 to vector<32x128xf32>
    %104 = arith.mulf %103, %100 : vector<32x128xf32>
    %105 = arith.select %102, %100, %104 : vector<32x128xi1>, vector<32x128xf32>
    %106 = vector.extract_strided_slice %2 {offsets = [0, 0], sizes = [32, 1], strides = [1, 1]} : vector<32x32xf32> to vector<32x1xf32>
    %107 = vector.extract_strided_slice %105 {offsets = [0, 0], sizes = [1, 128], strides = [1, 1]} : vector<32x128xf32> to vector<1x128xf32>
    %108 = vector.broadcast %106 : vector<32x1xf32> to vector<32x128xf32>
    %109 = vector.broadcast %107 : vector<1x128xf32> to vector<32x128xf32>
    %110 = arith.mulf %108, %109 : vector<32x128xf32>
    %111 = vector.extract_strided_slice %2 {offsets = [0, 1], sizes = [32, 1], strides = [1, 1]} : vector<32x32xf32> to vector<32x1xf32>
    %112 = vector.extract_strided_slice %105 {offsets = [1, 0], sizes = [1, 128], strides = [1, 1]} : vector<32x128xf32> to vector<1x128xf32>
    %113 = vector.broadcast %111 : vector<32x1xf32> to vector<32x128xf32>
    %114 = vector.broadcast %112 : vector<1x128xf32> to vector<32x128xf32>
    %115 = arith.mulf %113, %114 : vector<32x128xf32>
    %116 = arith.addf %110, %115 : vector<32x128xf32>
    %117 = vector.extract_strided_slice %2 {offsets = [0, 2], sizes = [32, 1], strides = [1, 1]} : vector<32x32xf32> to vector<32x1xf32>
    %118 = vector.extract_strided_slice %105 {offsets = [2, 0], sizes = [1, 128], strides = [1, 1]} : vector<32x128xf32> to vector<1x128xf32>
    %119 = vector.broadcast %117 : vector<32x1xf32> to vector<32x128xf32>
    %120 = vector.broadcast %118 : vector<1x128xf32> to vector<32x128xf32>
    %121 = arith.mulf %119, %120 : vector<32x128xf32>
    %122 = arith.addf %116, %121 : vector<32x128xf32>
    %123 = vector.extract_strided_slice %2 {offsets = [0, 3], sizes = [32, 1], strides = [1, 1]} : vector<32x32xf32> to vector<32x1xf32>
    %124 = vector.extract_strided_slice %105 {offsets = [3, 0], sizes = [1, 128], strides = [1, 1]} : vector<32x128xf32> to vector<1x128xf32>
    %125 = vector.broadcast %123 : vector<32x1xf32> to vector<32x128xf32>
    %126 = vector.broadcast %124 : vector<1x128xf32> to vector<32x128xf32>
    %127 = arith.mulf %125, %126 : vector<32x128xf32>
    %128 = arith.addf %122, %127 : vector<32x128xf32>
    %129 = vector.extract_strided_slice %2 {offsets = [0, 4], sizes = [32, 1], strides = [1, 1]} : vector<32x32xf32> to vector<32x1xf32>
    %130 = vector.extract_strided_slice %105 {offsets = [4, 0], sizes = [1, 128], strides = [1, 1]} : vector<32x128xf32> to vector<1x128xf32>
    %131 = vector.broadcast %129 : vector<32x1xf32> to vector<32x128xf32>
    %132 = vector.broadcast %130 : vector<1x128xf32> to vector<32x128xf32>
    %133 = arith.mulf %131, %132 : vector<32x128xf32>
    %134 = arith.addf %128, %133 : vector<32x128xf32>
    %135 = vector.extract_strided_slice %2 {offsets = [0, 5], sizes = [32, 1], strides = [1, 1]} : vector<32x32xf32> to vector<32x1xf32>
    %136 = vector.extract_strided_slice %105 {offsets = [5, 0], sizes = [1, 128], strides = [1, 1]} : vector<32x128xf32> to vector<1x128xf32>
    %137 = vector.broadcast %135 : vector<32x1xf32> to vector<32x128xf32>
    %138 = vector.broadcast %136 : vector<1x128xf32> to vector<32x128xf32>
    %139 = arith.mulf %137, %138 : vector<32x128xf32>
    %140 = arith.addf %134, %139 : vector<32x128xf32>
    %141 = vector.extract_strided_slice %2 {offsets = [0, 6], sizes = [32, 1], strides = [1, 1]} : vector<32x32xf32> to vector<32x1xf32>
    %142 = vector.extract_strided_slice %105 {offsets = [6, 0], sizes = [1, 128], strides = [1, 1]} : vector<32x128xf32> to vector<1x128xf32>
    %143 = vector.broadcast %141 : vector<32x1xf32> to vector<32x128xf32>
    %144 = vector.broadcast %142 : vector<1x128xf32> to vector<32x128xf32>
    %145 = arith.mulf %143, %144 : vector<32x128xf32>
    %146 = arith.addf %140, %145 : vector<32x128xf32>
    %147 = vector.extract_strided_slice %2 {offsets = [0, 7], sizes = [32, 1], strides = [1, 1]} : vector<32x32xf32> to vector<32x1xf32>
    %148 = vector.extract_strided_slice %105 {offsets = [7, 0], sizes = [1, 128], strides = [1, 1]} : vector<32x128xf32> to vector<1x128xf32>
    %149 = vector.broadcast %147 : vector<32x1xf32> to vector<32x128xf32>
    %150 = vector.broadcast %148 : vector<1x128xf32> to vector<32x128xf32>
    %151 = arith.mulf %149, %150 : vector<32x128xf32>
    %152 = arith.addf %146, %151 : vector<32x128xf32>
    %153 = vector.extract_strided_slice %2 {offsets = [0, 8], sizes = [32, 1], strides = [1, 1]} : vector<32x32xf32> to vector<32x1xf32>
    %154 = vector.extract_strided_slice %105 {offsets = [8, 0], sizes = [1, 128], strides = [1, 1]} : vector<32x128xf32> to vector<1x128xf32>
    %155 = vector.broadcast %153 : vector<32x1xf32> to vector<32x128xf32>
    %156 = vector.broadcast %154 : vector<1x128xf32> to vector<32x128xf32>
    %157 = arith.mulf %155, %156 : vector<32x128xf32>
    %158 = arith.addf %152, %157 : vector<32x128xf32>
    %159 = vector.extract_strided_slice %2 {offsets = [0, 9], sizes = [32, 1], strides = [1, 1]} : vector<32x32xf32> to vector<32x1xf32>
    %160 = vector.extract_strided_slice %105 {offsets = [9, 0], sizes = [1, 128], strides = [1, 1]} : vector<32x128xf32> to vector<1x128xf32>
    %161 = vector.broadcast %159 : vector<32x1xf32> to vector<32x128xf32>
    %162 = vector.broadcast %160 : vector<1x128xf32> to vector<32x128xf32>
    %163 = arith.mulf %161, %162 : vector<32x128xf32>
    %164 = arith.addf %158, %163 : vector<32x128xf32>
    %165 = vector.extract_strided_slice %2 {offsets = [0, 10], sizes = [32, 1], strides = [1, 1]} : vector<32x32xf32> to vector<32x1xf32>
    %166 = vector.extract_strided_slice %105 {offsets = [10, 0], sizes = [1, 128], strides = [1, 1]} : vector<32x128xf32> to vector<1x128xf32>
    %167 = vector.broadcast %165 : vector<32x1xf32> to vector<32x128xf32>
    %168 = vector.broadcast %166 : vector<1x128xf32> to vector<32x128xf32>
    %169 = arith.mulf %167, %168 : vector<32x128xf32>
    %170 = arith.addf %164, %169 : vector<32x128xf32>
    %171 = vector.extract_strided_slice %2 {offsets = [0, 11], sizes = [32, 1], strides = [1, 1]} : vector<32x32xf32> to vector<32x1xf32>
    %172 = vector.extract_strided_slice %105 {offsets = [11, 0], sizes = [1, 128], strides = [1, 1]} : vector<32x128xf32> to vector<1x128xf32>
    %173 = vector.broadcast %171 : vector<32x1xf32> to vector<32x128xf32>
    %174 = vector.broadcast %172 : vector<1x128xf32> to vector<32x128xf32>
    %175 = arith.mulf %173, %174 : vector<32x128xf32>
    %176 = arith.addf %170, %175 : vector<32x128xf32>
    %177 = vector.extract_strided_slice %2 {offsets = [0, 12], sizes = [32, 1], strides = [1, 1]} : vector<32x32xf32> to vector<32x1xf32>
    %178 = vector.extract_strided_slice %105 {offsets = [12, 0], sizes = [1, 128], strides = [1, 1]} : vector<32x128xf32> to vector<1x128xf32>
    %179 = vector.broadcast %177 : vector<32x1xf32> to vector<32x128xf32>
    %180 = vector.broadcast %178 : vector<1x128xf32> to vector<32x128xf32>
    %181 = arith.mulf %179, %180 : vector<32x128xf32>
    %182 = arith.addf %176, %181 : vector<32x128xf32>
    %183 = vector.extract_strided_slice %2 {offsets = [0, 13], sizes = [32, 1], strides = [1, 1]} : vector<32x32xf32> to vector<32x1xf32>
    %184 = vector.extract_strided_slice %105 {offsets = [13, 0], sizes = [1, 128], strides = [1, 1]} : vector<32x128xf32> to vector<1x128xf32>
    %185 = vector.broadcast %183 : vector<32x1xf32> to vector<32x128xf32>
    %186 = vector.broadcast %184 : vector<1x128xf32> to vector<32x128xf32>
    %187 = arith.mulf %185, %186 : vector<32x128xf32>
    %188 = arith.addf %182, %187 : vector<32x128xf32>
    %189 = vector.extract_strided_slice %2 {offsets = [0, 14], sizes = [32, 1], strides = [1, 1]} : vector<32x32xf32> to vector<32x1xf32>
    %190 = vector.extract_strided_slice %105 {offsets = [14, 0], sizes = [1, 128], strides = [1, 1]} : vector<32x128xf32> to vector<1x128xf32>
    %191 = vector.broadcast %189 : vector<32x1xf32> to vector<32x128xf32>
    %192 = vector.broadcast %190 : vector<1x128xf32> to vector<32x128xf32>
    %193 = arith.mulf %191, %192 : vector<32x128xf32>
    %194 = arith.addf %188, %193 : vector<32x128xf32>
    %195 = vector.extract_strided_slice %2 {offsets = [0, 15], sizes = [32, 1], strides = [1, 1]} : vector<32x32xf32> to vector<32x1xf32>
    %196 = vector.extract_strided_slice %105 {offsets = [15, 0], sizes = [1, 128], strides = [1, 1]} : vector<32x128xf32> to vector<1x128xf32>
    %197 = vector.broadcast %195 : vector<32x1xf32> to vector<32x128xf32>
    %198 = vector.broadcast %196 : vector<1x128xf32> to vector<32x128xf32>
    %199 = arith.mulf %197, %198 : vector<32x128xf32>
    %200 = arith.addf %194, %199 : vector<32x128xf32>
    %201 = vector.extract_strided_slice %2 {offsets = [0, 16], sizes = [32, 1], strides = [1, 1]} : vector<32x32xf32> to vector<32x1xf32>
    %202 = vector.extract_strided_slice %105 {offsets = [16, 0], sizes = [1, 128], strides = [1, 1]} : vector<32x128xf32> to vector<1x128xf32>
    %203 = vector.broadcast %201 : vector<32x1xf32> to vector<32x128xf32>
    %204 = vector.broadcast %202 : vector<1x128xf32> to vector<32x128xf32>
    %205 = arith.mulf %203, %204 : vector<32x128xf32>
    %206 = arith.addf %200, %205 : vector<32x128xf32>
    %207 = vector.extract_strided_slice %2 {offsets = [0, 17], sizes = [32, 1], strides = [1, 1]} : vector<32x32xf32> to vector<32x1xf32>
    %208 = vector.extract_strided_slice %105 {offsets = [17, 0], sizes = [1, 128], strides = [1, 1]} : vector<32x128xf32> to vector<1x128xf32>
    %209 = vector.broadcast %207 : vector<32x1xf32> to vector<32x128xf32>
    %210 = vector.broadcast %208 : vector<1x128xf32> to vector<32x128xf32>
    %211 = arith.mulf %209, %210 : vector<32x128xf32>
    %212 = arith.addf %206, %211 : vector<32x128xf32>
    %213 = vector.extract_strided_slice %2 {offsets = [0, 18], sizes = [32, 1], strides = [1, 1]} : vector<32x32xf32> to vector<32x1xf32>
    %214 = vector.extract_strided_slice %105 {offsets = [18, 0], sizes = [1, 128], strides = [1, 1]} : vector<32x128xf32> to vector<1x128xf32>
    %215 = vector.broadcast %213 : vector<32x1xf32> to vector<32x128xf32>
    %216 = vector.broadcast %214 : vector<1x128xf32> to vector<32x128xf32>
    %217 = arith.mulf %215, %216 : vector<32x128xf32>
    %218 = arith.addf %212, %217 : vector<32x128xf32>
    %219 = vector.extract_strided_slice %2 {offsets = [0, 19], sizes = [32, 1], strides = [1, 1]} : vector<32x32xf32> to vector<32x1xf32>
    %220 = vector.extract_strided_slice %105 {offsets = [19, 0], sizes = [1, 128], strides = [1, 1]} : vector<32x128xf32> to vector<1x128xf32>
    %221 = vector.broadcast %219 : vector<32x1xf32> to vector<32x128xf32>
    %222 = vector.broadcast %220 : vector<1x128xf32> to vector<32x128xf32>
    %223 = arith.mulf %221, %222 : vector<32x128xf32>
    %224 = arith.addf %218, %223 : vector<32x128xf32>
    %225 = vector.extract_strided_slice %2 {offsets = [0, 20], sizes = [32, 1], strides = [1, 1]} : vector<32x32xf32> to vector<32x1xf32>
    %226 = vector.extract_strided_slice %105 {offsets = [20, 0], sizes = [1, 128], strides = [1, 1]} : vector<32x128xf32> to vector<1x128xf32>
    %227 = vector.broadcast %225 : vector<32x1xf32> to vector<32x128xf32>
    %228 = vector.broadcast %226 : vector<1x128xf32> to vector<32x128xf32>
    %229 = arith.mulf %227, %228 : vector<32x128xf32>
    %230 = arith.addf %224, %229 : vector<32x128xf32>
    %231 = vector.extract_strided_slice %2 {offsets = [0, 21], sizes = [32, 1], strides = [1, 1]} : vector<32x32xf32> to vector<32x1xf32>
    %232 = vector.extract_strided_slice %105 {offsets = [21, 0], sizes = [1, 128], strides = [1, 1]} : vector<32x128xf32> to vector<1x128xf32>
    %233 = vector.broadcast %231 : vector<32x1xf32> to vector<32x128xf32>
    %234 = vector.broadcast %232 : vector<1x128xf32> to vector<32x128xf32>
    %235 = arith.mulf %233, %234 : vector<32x128xf32>
    %236 = arith.addf %230, %235 : vector<32x128xf32>
    %237 = vector.extract_strided_slice %2 {offsets = [0, 22], sizes = [32, 1], strides = [1, 1]} : vector<32x32xf32> to vector<32x1xf32>
    %238 = vector.extract_strided_slice %105 {offsets = [22, 0], sizes = [1, 128], strides = [1, 1]} : vector<32x128xf32> to vector<1x128xf32>
    %239 = vector.broadcast %237 : vector<32x1xf32> to vector<32x128xf32>
    %240 = vector.broadcast %238 : vector<1x128xf32> to vector<32x128xf32>
    %241 = arith.mulf %239, %240 : vector<32x128xf32>
    %242 = arith.addf %236, %241 : vector<32x128xf32>
    %243 = vector.extract_strided_slice %2 {offsets = [0, 23], sizes = [32, 1], strides = [1, 1]} : vector<32x32xf32> to vector<32x1xf32>
    %244 = vector.extract_strided_slice %105 {offsets = [23, 0], sizes = [1, 128], strides = [1, 1]} : vector<32x128xf32> to vector<1x128xf32>
    %245 = vector.broadcast %243 : vector<32x1xf32> to vector<32x128xf32>
    %246 = vector.broadcast %244 : vector<1x128xf32> to vector<32x128xf32>
    %247 = arith.mulf %245, %246 : vector<32x128xf32>
    %248 = arith.addf %242, %247 : vector<32x128xf32>
    %249 = vector.extract_strided_slice %2 {offsets = [0, 24], sizes = [32, 1], strides = [1, 1]} : vector<32x32xf32> to vector<32x1xf32>
    %250 = vector.extract_strided_slice %105 {offsets = [24, 0], sizes = [1, 128], strides = [1, 1]} : vector<32x128xf32> to vector<1x128xf32>
    %251 = vector.broadcast %249 : vector<32x1xf32> to vector<32x128xf32>
    %252 = vector.broadcast %250 : vector<1x128xf32> to vector<32x128xf32>
    %253 = arith.mulf %251, %252 : vector<32x128xf32>
    %254 = arith.addf %248, %253 : vector<32x128xf32>
    %255 = vector.extract_strided_slice %2 {offsets = [0, 25], sizes = [32, 1], strides = [1, 1]} : vector<32x32xf32> to vector<32x1xf32>
    %256 = vector.extract_strided_slice %105 {offsets = [25, 0], sizes = [1, 128], strides = [1, 1]} : vector<32x128xf32> to vector<1x128xf32>
    %257 = vector.broadcast %255 : vector<32x1xf32> to vector<32x128xf32>
    %258 = vector.broadcast %256 : vector<1x128xf32> to vector<32x128xf32>
    %259 = arith.mulf %257, %258 : vector<32x128xf32>
    %260 = arith.addf %254, %259 : vector<32x128xf32>
    %261 = vector.extract_strided_slice %2 {offsets = [0, 26], sizes = [32, 1], strides = [1, 1]} : vector<32x32xf32> to vector<32x1xf32>
    %262 = vector.extract_strided_slice %105 {offsets = [26, 0], sizes = [1, 128], strides = [1, 1]} : vector<32x128xf32> to vector<1x128xf32>
    %263 = vector.broadcast %261 : vector<32x1xf32> to vector<32x128xf32>
    %264 = vector.broadcast %262 : vector<1x128xf32> to vector<32x128xf32>
    %265 = arith.mulf %263, %264 : vector<32x128xf32>
    %266 = arith.addf %260, %265 : vector<32x128xf32>
    %267 = vector.extract_strided_slice %2 {offsets = [0, 27], sizes = [32, 1], strides = [1, 1]} : vector<32x32xf32> to vector<32x1xf32>
    %268 = vector.extract_strided_slice %105 {offsets = [27, 0], sizes = [1, 128], strides = [1, 1]} : vector<32x128xf32> to vector<1x128xf32>
    %269 = vector.broadcast %267 : vector<32x1xf32> to vector<32x128xf32>
    %270 = vector.broadcast %268 : vector<1x128xf32> to vector<32x128xf32>
    %271 = arith.mulf %269, %270 : vector<32x128xf32>
    %272 = arith.addf %266, %271 : vector<32x128xf32>
    %273 = vector.extract_strided_slice %2 {offsets = [0, 28], sizes = [32, 1], strides = [1, 1]} : vector<32x32xf32> to vector<32x1xf32>
    %274 = vector.extract_strided_slice %105 {offsets = [28, 0], sizes = [1, 128], strides = [1, 1]} : vector<32x128xf32> to vector<1x128xf32>
    %275 = vector.broadcast %273 : vector<32x1xf32> to vector<32x128xf32>
    %276 = vector.broadcast %274 : vector<1x128xf32> to vector<32x128xf32>
    %277 = arith.mulf %275, %276 : vector<32x128xf32>
    %278 = arith.addf %272, %277 : vector<32x128xf32>
    %279 = vector.extract_strided_slice %2 {offsets = [0, 29], sizes = [32, 1], strides = [1, 1]} : vector<32x32xf32> to vector<32x1xf32>
    %280 = vector.extract_strided_slice %105 {offsets = [29, 0], sizes = [1, 128], strides = [1, 1]} : vector<32x128xf32> to vector<1x128xf32>
    %281 = vector.broadcast %279 : vector<32x1xf32> to vector<32x128xf32>
    %282 = vector.broadcast %280 : vector<1x128xf32> to vector<32x128xf32>
    %283 = arith.mulf %281, %282 : vector<32x128xf32>
    %284 = arith.addf %278, %283 : vector<32x128xf32>
    %285 = vector.extract_strided_slice %2 {offsets = [0, 30], sizes = [32, 1], strides = [1, 1]} : vector<32x32xf32> to vector<32x1xf32>
    %286 = vector.extract_strided_slice %105 {offsets = [30, 0], sizes = [1, 128], strides = [1, 1]} : vector<32x128xf32> to vector<1x128xf32>
    %287 = vector.broadcast %285 : vector<32x1xf32> to vector<32x128xf32>
    %288 = vector.broadcast %286 : vector<1x128xf32> to vector<32x128xf32>
    %289 = arith.mulf %287, %288 : vector<32x128xf32>
    %290 = arith.addf %284, %289 : vector<32x128xf32>
    %291 = vector.extract_strided_slice %2 {offsets = [0, 31], sizes = [32, 1], strides = [1, 1]} : vector<32x32xf32> to vector<32x1xf32>
    %292 = vector.extract_strided_slice %105 {offsets = [31, 0], sizes = [1, 128], strides = [1, 1]} : vector<32x128xf32> to vector<1x128xf32>
    %293 = vector.broadcast %291 : vector<32x1xf32> to vector<32x128xf32>
    %294 = vector.broadcast %292 : vector<1x128xf32> to vector<32x128xf32>
    %295 = arith.mulf %293, %294 : vector<32x128xf32>
    %296 = arith.addf %290, %295 : vector<32x128xf32>
    %c0_8 = arith.constant 0 : index
    %c0_9 = arith.constant 0 : index
    %297 = vector.load %arg5[%c0_8, %c0_9] : memref<32x1xf32, #tpu.memory_space<vmem>>, vector<32x1xf32>
    %298 = vector.broadcast %297 : vector<32x1xf32> to vector<32x128xf32>
    %299 = arith.addf %296, %298 : vector<32x128xf32>
    %cst_10 = arith.constant 0.000000e+00 : f32
    %300 = vector.broadcast %cst_10 : f32 to vector<32x128xf32>
    %301 = arith.cmpf ogt, %299, %300 : vector<32x128xf32>
    %cst_11 = arith.constant 0.00999999977 : f32
    %302 = vector.broadcast %cst_11 : f32 to vector<32x128xf32>
    %303 = arith.mulf %302, %299 : vector<32x128xf32>
    %304 = arith.select %301, %299, %303 : vector<32x128xi1>, vector<32x128xf32>
    %c0_12 = arith.constant 0 : index
    %c0_13 = arith.constant 0 : index
    %305 = vector.load %arg6[%c0_12, %c0_13] : memref<32x1xf32, #tpu.memory_space<vmem>>, vector<32x1xf32>
    %306 = vector.broadcast %305 : vector<32x1xf32> to vector<32x128xf32>
    %307 = arith.mulf %306, %304 : vector<32x128xf32>
    %cst_14 = arith.constant dense<0.000000e+00> : vector<128xf32>
    %308 = vector.multi_reduction <add>, %307, %cst_14 [0] : vector<32x128xf32> to vector<128xf32>
    %309 = vector.shape_cast %308 : vector<128xf32> to vector<1x128xf32>
    %c0_15 = arith.constant 0 : index
    %c0_16 = arith.constant 0 : index
    %310 = vector.load %arg7[%c0_15, %c0_16] : memref<1x128xf32, #tpu.memory_space<vmem>>, vector<1x128xf32>
    tpu.vector_store %arg7[%c0_15, %c0_16], %309 {strides = array<i32>} : memref<1x128xf32, #tpu.memory_space<vmem>>, vector<1x128xf32>,
    return
  }
  func.func @transform_0(%arg0: i32) -> (i32, i32) {
    %c0_i32 = arith.constant 0 : i32
    %c0_i32_0 = arith.constant 0 : i32
    return %c0_i32, %arg0 : i32, i32
  }
  func.func @transform_1(%arg0: i32) -> (i32, i32) {
    %c0_i32 = arith.constant 0 : i32
    %c0_i32_0 = arith.constant 0 : i32
    %c0_i32_1 = arith.constant 0 : i32
    return %c0_i32, %c0_i32_0 : i32, i32
  }
  func.func @transform_2(%arg0: i32) -> (i32, i32) {
    %c0_i32 = arith.constant 0 : i32
    %c0_i32_0 = arith.constant 0 : i32
    %c0_i32_1 = arith.constant 0 : i32
    return %c0_i32, %c0_i32_0 : i32, i32
  }
  func.func @transform_3(%arg0: i32) -> (i32, i32) {
    %c0_i32 = arith.constant 0 : i32
    %c0_i32_0 = arith.constant 0 : i32
    %c0_i32_1 = arith.constant 0 : i32
    return %c0_i32, %c0_i32_0 : i32, i32
  }
  func.func @transform_4(%arg0: i32) -> (i32, i32) {
    %c0_i32 = arith.constant 0 : i32
    %c0_i32_0 = arith.constant 0 : i32
    %c0_i32_1 = arith.constant 0 : i32
    return %c0_i32, %c0_i32_0 : i32, i32
  }
  func.func @transform_5(%arg0: i32) -> (i32, i32) {
    %c0_i32 = arith.constant 0 : i32
    %c0_i32_0 = arith.constant 0 : i32
    %c0_i32_1 = arith.constant 0 : i32
    return %c0_i32, %c0_i32_0 : i32, i32
  }
  func.func @transform_6(%arg0: i32) -> (i32, i32) {
    %c0_i32 = arith.constant 0 : i32
    %c0_i32_0 = arith.constant 0 : i32
    return %c0_i32, %arg0 : i32, i32
  }
}

</mosaic_0001>

<bundles_post_ra>
// kernel: mlp_value_forward.1
= control target key start
LH: loop header
LB: loop body
LE: loop exit
PB: predicated region body
PF: predicated region fallthrough
CT: control target
= control target key end

     0   :  { %v2630_v0 = vmov 0   ;;  %v1624_v6 = vmov 1   ;;  %v1625_v9 = vmov 2   ;;  %v1626_v10 = vmov 3   ;;  %s2620_s1 = inlined_call_operand.vmem [shape: f32[32,16], index: 1, kind: input, shape index: {}]   ;;  %s2621_s2 = inlined_call_operand.vmem [shape: f32[32,1], index: 2, kind: input, shape index: {}]   ;;  %s2622_s3 = inlined_call_operand.vmem [shape: f32[32,32], index: 3, kind: input, shape index: {}]   ;;  %s2623_s0 = inlined_call_operand.vmem [shape: f32[16,128], index: 0, kind: input, shape index: {}]   ;;  %s2624_s4 = inlined_call_operand.vmem [shape: f32[32,1], index: 4, kind: input, shape index: {}]   ;;  %s2625_s5 = inlined_call_operand.vmem [shape: f32[32,1], index: 5, kind: input, shape index: {}]   ;;  %s2626_s6 = inlined_call_operand.vmem [shape: f32[1,128], index: 6, kind: output, shape index: {}]  }
   0x1   :  { %1532 = vset.pattern.permute.xlu1 %v2630_v0  ;;  %1531 = vset.pattern.permute.xlu0 %v2630_v0  ;;  %v1695_v1 = vld [vmem:[%s2620_s1 + $0x10] sm:$0xff]  ;;  %v1700_v2 = vld [vmem:[%s2620_s1] sm:$0xff]  ;;  %v1707_v3 = vld [vmem:[%s2620_s1 + $0x18] sm:$0xff]  ;;  %v1627_v12 = vmov 4   ;;  %v1628_v14 = vmov 5   ;;  %v2641_v15 = vmov 6  }
   0x2   :  { %45 = vperm.xlu1 %1532, %v1695_v1   ;;  %35 = vperm.xlu0 %1531, %v1700_v2   ;;  %v1712_v4 = vld [vmem:[%s2620_s1 + $0x8] sm:$0xff]  ;;  %v1724_v7 = vld [vmem:[%s2622_s3] sm:$0xff]  ;;  %v1731_v8 = vld [vmem:[%s2622_s3 + $0x10] sm:$0xff]  ;;  %v2639_v16 = vmov 7   ;;  %v2638_v17 = vmov 8   ;;  %v2637_v18 = vmov 9  }
   0x3   :  { %v482_v5 = vld [vmem:[%s2621_s2 + $0x8] sm:$0xff]  ;;  %v1746_v11 = vld [vmem:[%s2622_s3 + $0x18] sm:$0xff]  ;;  %v2636_v19 = vmov 10   ;;  %v2635_v20 = vmov 11   ;;  %v2633_v22 = vmov 12   ;;  %v2632_v30 = vmov 13  }
   0x4   :  { %v1757_v13 = vld [vmem:[%s2622_s3 + $0x8] sm:$0xff]  ;;  %v2628_v34 = vmov 14   ;;  %v2627_v41 = vmov 15   ;;  %v481_v46 = vld [vmem:[%s2621_s2] sm:$0xff]  ;;  %v483_v48 = vld [vmem:[%s2621_s2 + $0x10] sm:$0xff] }
   0x5   :  { %v484_v51 = vld [vmem:[%s2621_s2 + $0x18] sm:$0xff] }
   0x6   :  { %50 = vperm.xlu1 %1532, %v1707_v3   ;;  %40 = vperm.xlu0 %1531, %v1712_v4  }
   0xa   :  { %1533 = vset.pattern.permute.xlu1 %v1624_v6  ;;  %492 = vperm.xlu0 %1531, %v482_v5  }
   0xb   :  { %66 = vperm.xlu1 %1533, %v1712_v4  }
   0xe   :  { %523 = vperm.xlu0 %1531, %v1724_v7  }
   0xf   :  { %70 = vperm.xlu1 %1533, %v1695_v1  }
  0x12   :  { %533 = vperm.xlu0 %1531, %v1731_v8  }
  0x13   :  { %1534 = vset.pattern.permute.xlu1 %v1625_v9 }
  0x14   :  { %90 = vperm.xlu1 %1534, %v1700_v2  }
  0x16   :  { %1549 = vset.pattern.permute.xlu0 %v1624_v6 }
  0x17   :  { %62 = vperm.xlu0 %1549, %v1700_v2  }
  0x18   :  { %98 = vperm.xlu1 %1534, %v1695_v1  }
  0x1b   :  { %74 = vperm.xlu0 %1549, %v1707_v3  }
  0x1c   :  { %102 = vperm.xlu1 %1534, %v1707_v3  }
  0x1f   :  { %550 = vperm.xlu0 %1549, %v1724_v7  }
  0x20   :  { %1535 = vset.pattern.permute.xlu1 %v1626_v10 }
  0x21   :  { %122 = vperm.xlu1 %1535, %v1712_v4  }
  0x23   :  { %562 = vperm.xlu0 %1549, %v1746_v11  }
  0x25   :  { %126 = vperm.xlu1 %1535, %v1695_v1  }
  0x27   :  { %1551 = vset.pattern.permute.xlu0 %v1625_v9 }
  0x28   :  { %94 = vperm.xlu0 %1551, %v1712_v4  }
  0x29   :  { %1536 = vset.pattern.permute.xlu1 %v1627_v12 }
  0x2a   :  { %146 = vperm.xlu1 %1536, %v1700_v2  }
  0x2c   :  { %582 = vperm.xlu0 %1551, %v1757_v13  }
  0x2e   :  { %154 = vperm.xlu1 %1536, %v1695_v1  }
  0x30   :  { %1553 = vset.pattern.permute.xlu0 %v1626_v10 }
  0x31   :  { %118 = vperm.xlu0 %1553, %v1700_v2  }
  0x32   :  { %158 = vperm.xlu1 %1536, %v1707_v3  }
  0x35   :  { %130 = vperm.xlu0 %1553, %v1707_v3  }
  0x36   :  { %1537 = vset.pattern.permute.xlu1 %v1628_v14 }
  0x37   :  { %178 = vperm.xlu1 %1537, %v1712_v4  }
  0x39   :  { %606 = vperm.xlu0 %1553, %v1724_v7  }
  0x3b   :  { %182 = vperm.xlu1 %1537, %v1695_v1  }
  0x3d   :  { %618 = vperm.xlu0 %1553, %v1746_v11  }
  0x3f   :  { %1538 = vset.pattern.permute.xlu1 %v2641_v15 }
  0x40   :  { %202 = vperm.xlu1 %1538, %v1700_v2  }
  0x41   :  { %1555 = vset.pattern.permute.xlu0 %v1627_v12 }
  0x42   :  { %150 = vperm.xlu0 %1555, %v1712_v4  }
  0x44   :  { %210 = vperm.xlu1 %1538, %v1695_v1  }
  0x46   :  { %638 = vperm.xlu0 %1555, %v1757_v13  }
  0x48   :  { %214 = vperm.xlu1 %1538, %v1707_v3  }
  0x4a   :  { %1557 = vset.pattern.permute.xlu0 %v1628_v14 }
  0x4b   :  { %174 = vperm.xlu0 %1557, %v1700_v2  }
  0x4c   :  { %1539 = vset.pattern.permute.xlu1 %v2639_v16 }
  0x4d   :  { %234 = vperm.xlu1 %1539, %v1712_v4  }
  0x4f   :  { %186 = vperm.xlu0 %1557, %v1707_v3  }
  0x51   :  { %238 = vperm.xlu1 %1539, %v1695_v1  }
  0x53   :  { %662 = vperm.xlu0 %1557, %v1724_v7  }
  0x55   :  { %1540 = vset.pattern.permute.xlu1 %v2638_v17 }
  0x56   :  { %258 = vperm.xlu1 %1540, %v1700_v2  }
  0x57   :  { %674 = vperm.xlu0 %1557, %v1746_v11  }
  0x5a   :  { %266 = vperm.xlu1 %1540, %v1695_v1  }
  0x5b   :  { %1559 = vset.pattern.permute.xlu0 %v2641_v15 }
  0x5c   :  { %206 = vperm.xlu0 %1559, %v1712_v4  }
  0x5e   :  { %270 = vperm.xlu1 %1540, %v1707_v3  }
  0x60   :  { %694 = vperm.xlu0 %1559, %v1757_v13  }
  0x62   :  { %1541 = vset.pattern.permute.xlu1 %v2637_v18 }
  0x63   :  { %290 = vperm.xlu1 %1541, %v1712_v4  }
  0x64   :  { %1561 = vset.pattern.permute.xlu0 %v2639_v16 }
  0x65   :  { %230 = vperm.xlu0 %1561, %v1700_v2  }
  0x67   :  { %294 = vperm.xlu1 %1541, %v1695_v1  }
  0x69   :  { %242 = vperm.xlu0 %1561, %v1707_v3  }
  0x6b   :  { %1542 = vset.pattern.permute.xlu1 %v2636_v19 }
  0x6c   :  { %314 = vperm.xlu1 %1542, %v1700_v2  }
  0x6d   :  { %718 = vperm.xlu0 %1561, %v1724_v7  }
  0x70   :  { %322 = vperm.xlu1 %1542, %v1695_v1  }
  0x71   :  { %730 = vperm.xlu0 %1561, %v1746_v11  }
  0x74   :  { %326 = vperm.xlu1 %1542, %v1707_v3  }
  0x75   :  { %1563 = vset.pattern.permute.xlu0 %v2638_v17 }
  0x76   :  { %262 = vperm.xlu0 %1563, %v1712_v4  }
  0x78   :  { %1543 = vset.pattern.permute.xlu1 %v2635_v20 }
  0x79   :  { %346 = vperm.xlu1 %1543, %v1712_v4  }
  0x7a   :  { %750 = vperm.xlu0 %1563, %v1757_v13  }
  0x7d   :  { %350 = vperm.xlu1 %1543, %v1695_v1  }
  0x7e   :  { %1565 = vset.pattern.permute.xlu0 %v2637_v18  ;;  %v2642_v18 = vmov 19  }
  0x7f   :  { %286 = vperm.xlu0 %1565, %v1700_v2  }
  0x81   :  { %v1813_v21 = vpop.permute.xlu1 %45  ;;  %1544 = vset.pattern.permute.xlu1 %v2633_v22  ;;  %v1816_v23 = vpop.permute.xlu0 %35 }
  0x82   :  { %2683 = vst [vmem:[#allocation2_spill] sm:$0xff] %v1813_v21  ;;  %370 = vperm.xlu1 %1544, %v1700_v2  }
  0x83   :  { %298 = vperm.xlu0 %1565, %v1707_v3  }
  0x85   :  { %v1820_v24 = vpop.permute.xlu1 %50  ;;  %v1822_v25 = vpop.permute.xlu0 %40 }
  0x86   :  { %378 = vperm.xlu1 %1544, %v1695_v1  }
  0x87   :  { %774 = vperm.xlu0 %1565, %v1724_v7  }
  0x89   :  { %v1826_v26 = vpop.permute.xlu0 %492 }
  0x8a   :  { %v1828_v27 = vpop.permute.xlu1 %66  ;;  %382 = vperm.xlu1 %1544, %v1707_v3  }
  0x8b   :  { %786 = vperm.xlu0 %1565, %v1746_v11  }
  0x8d   :  { %v1832_v28 = vpop.permute.xlu0 %523 }
  0x8e   :  { %v1834_v29 = vpop.permute.xlu1 %70  ;;  %1545 = vset.pattern.permute.xlu1 %v2632_v30 }
  0x8f   :  { %2684 = vst [vmem:[#allocation3_spill] sm:$0xff] %v1834_v29  ;;  %402 = vperm.xlu1 %1545, %v1712_v4   ;;  %1567 = vset.pattern.permute.xlu0 %v2636_v19 }
  0x90   :  { %318 = vperm.xlu0 %1567, %v1712_v4  }
  0x91   :  { %v1840_v31 = vpop.permute.xlu0 %533 }
  0x93   :  { %406 = vperm.xlu1 %1545, %v1695_v1   ;;  %v1843_v32 = vpop.permute.xlu1 %90 }
  0x94   :  { %806 = vperm.xlu0 %1567, %v1757_v13  }
  0x96   :  { %v1846_v33 = vpop.permute.xlu0 %62 }
  0x97   :  { %1546 = vset.pattern.permute.xlu1 %v2628_v34  ;;  %v1849_v35 = vpop.permute.xlu1 %98 }
  0x98   :  { %2685 = vst [vmem:[#allocation4_spill] sm:$0xff] %v1849_v35  ;;  %426 = vperm.xlu1 %1546, %v1700_v2   ;;  %1569 = vset.pattern.permute.xlu0 %v2635_v20 }
  0x99   :  { %342 = vperm.xlu0 %1569, %v1700_v2  }
  0x9a   :  { %v1854_v36 = vpop.permute.xlu0 %74 }
  0x9b   :  { %v1856_v37 = vpop.permute.xlu1 %102 }
  0x9c   :  { %434 = vperm.xlu1 %1546, %v1695_v1  }
  0x9d   :  { %354 = vperm.xlu0 %1569, %v1707_v3  }
  0x9e   :  { %v1860_v38 = vpop.permute.xlu0 %550 }
  0xa0   :  { %438 = vperm.xlu1 %1546, %v1707_v3   ;;  %v1863_v39 = vpop.permute.xlu1 %122 }
  0xa1   :  { %830 = vperm.xlu0 %1569, %v1724_v7  }
  0xa2   :  { %v1866_v40 = vpop.permute.xlu0 %562 }
  0xa3   :  { %2686 = vst [vmem:[#allocation5_spill] sm:$0xff] %v1866_v40 }
  0xa4   :  { %1547 = vset.pattern.permute.xlu1 %v2627_v41  ;;  %v1869_v42 = vpop.permute.xlu1 %126 }
  0xa5   :  { %2687 = vst [vmem:[#allocation6_spill] sm:$0xff] %v1869_v42  ;;  %458 = vperm.xlu1 %1547, %v1712_v4   ;;  %842 = vperm.xlu0 %1569, %v1746_v11   ;;  %v2643_v42 = vmov 20  }
  0xa7   :  { %v1873_v43 = vpop.permute.xlu0 %94 }
  0xa9   :  { %462 = vperm.xlu1 %1547, %v1695_v1   ;;  %v1876_v44 = vpop.permute.xlu1 %146  ;;  %1571 = vset.pattern.permute.xlu0 %v2633_v22  ;;  %v2640_v22 = vmov 18  }
  0xaa   :  { %374 = vperm.xlu0 %1571, %v1712_v4  }
  0xab   :  { %v1880_v45 = vpop.permute.xlu0 %582 }
  0xad   :  { %1548 = vset.pattern.permute.xlu1 %v2630_v0  ;;  %v1886_v47 = vpop.permute.xlu1 %154 }
  0xae   :  { %2688 = vst [vmem:[#allocation7_spill] sm:$0xff] %v1886_v47  ;;  %487 = vperm.xlu1 %1548, %v481_v46   ;;  %862 = vperm.xlu0 %1571, %v1757_v13  }
  0xb0   :  { %v1892_v49 = vpop.permute.xlu0 %118 }
  0xb1   :  { %v1894_v50 = vpop.permute.xlu1 %158 }
  0xb2   :  { %497 = vperm.xlu1 %1548, %v483_v48   ;;  %1573 = vset.pattern.permute.xlu0 %v2632_v30  ;;  %v2629_v48 = vmov 16  }
  0xb3   :  { %398 = vperm.xlu0 %1573, %v1700_v2  }
  0xb4   :  { %v1901_v52 = vpop.permute.xlu0 %130 }
  0xb6   :  { %502 = vperm.xlu1 %1548, %v484_v51   ;;  %v1903_v53 = vpop.permute.xlu1 %178 }
  0xb7   :  { %410 = vperm.xlu0 %1573, %v1707_v3  }
  0xb8   :  { %v1906_v54 = vpop.permute.xlu0 %606 }
  0xb9   :  { %2689 = vst [vmem:[#allocation8_spill] sm:$0xff] %v1906_v54 }
  0xba   :  { %528 = vperm.xlu1 %1548, %v1757_v13   ;;  %v1909_v55 = vpop.permute.xlu1 %182 }
  0xbb   :  { %2690 = vst [vmem:[#allocation9_spill] sm:$0xff] %v1909_v55  ;;  %886 = vperm.xlu0 %1573, %v1724_v7  }
  0xbc   :  { %v1912_v56 = vpop.permute.xlu0 %618 }
  0xbd   :  { %2691 = vst [vmem:[#allocation10_spill] sm:$0xff] %v1912_v56 }
  0xbe   :  { %538 = vperm.xlu1 %1548, %v1746_v11  }
  0xbf   :  { %v1915_v57 = vpop.permute.xlu1 %202  ;;  %898 = vperm.xlu0 %1573, %v1746_v11  }
  0xc1   :  { %v1918_v58 = vpop.permute.xlu0 %150 }
  0xc2   :  { %1550 = vset.pattern.permute.xlu1 %v1624_v6 }
  0xc3   :  { %554 = vperm.xlu1 %1550, %v1757_v13   ;;  %v1922_v59 = vpop.permute.xlu1 %210  ;;  %1575 = vset.pattern.permute.xlu0 %v2628_v34 }
  0xc4   :  { %2692 = vst [vmem:[#allocation11_spill] sm:$0xff] %v1922_v59  ;;  %430 = vperm.xlu0 %1575, %v1712_v4  }
  0xc5   :  { %v1926_v60 = vpop.permute.xlu0 %638 }
  0xc6   :  { %2693 = vst [vmem:[#allocation12_spill] sm:$0xff] %v1926_v60  ;;  %v2645_v60 = vmov 22  }
  0xc7   :  { %558 = vperm.xlu1 %1550, %v1731_v8   ;;  %v1929_v61 = vpop.permute.xlu1 %214 }
  0xc8   :  { %918 = vperm.xlu0 %1575, %v1757_v13  }
  0xca   :  { %v1932_v62 = vpop.permute.xlu0 %174 }
  0xcb   :  { %1552 = vset.pattern.permute.xlu1 %v1625_v9 }
  0xcc   :  { %578 = vperm.xlu1 %1552, %v1724_v7   ;;  %v1936_v63 = vpop.permute.xlu1 %234  ;;  %1577 = vset.pattern.permute.xlu0 %v2627_v41  ;;  %v2634_v41 = vmov 17  }
  0xcd   :  { %454 = vperm.xlu0 %1577, %v1700_v2  }
  0xce   :  { %v1940_v1 = vpop.permute.xlu0 %186 }
  0xd0   :  { %586 = vperm.xlu1 %1552, %v1731_v8   ;;  %v1943_v4 = vpop.permute.xlu1 %238 }
  0xd1   :  { %2694 = vst [vmem:[#allocation13_spill] sm:$0xff] %v1943_v4  ;;  %466 = vperm.xlu0 %1577, %v1707_v3  }
  0xd2   :  { %v1946_v5 = vpop.permute.xlu0 %662 }
  0xd3   :  { %2695 = vst [vmem:[#allocation14_spill] sm:$0xff] %v1946_v5 }
  0xd4   :  { %590 = vperm.xlu1 %1552, %v1746_v11  }
  0xd5   :  { %v1949_v6 = vpop.permute.xlu1 %258  ;;  %942 = vperm.xlu0 %1577, %v1724_v7  }
  0xd6   :  { %v1952_v9 = vpop.permute.xlu0 %674 }
  0xd7   :  { %2696 = vst [vmem:[#allocation15_spill] sm:$0xff] %v1952_v9 }
  0xd8   :  { %1554 = vset.pattern.permute.xlu1 %v1626_v10 }
  0xd9   :  { %610 = vperm.xlu1 %1554, %v1757_v13   ;;  %v1956_v2 = vpop.permute.xlu1 %266  ;;  %954 = vperm.xlu0 %1577, %v1746_v11  }
  0xda   :  { %2697 = vst [vmem:[#allocation16_spill] sm:$0xff] %v1956_v2  ;;  %v2704_v2 = vmov 6  }
  0xdb   :  { %v1959_v46 = vpop.permute.xlu0 %206 }
  0xdd   :  { %614 = vperm.xlu1 %1554, %v1731_v8   ;;  %v1962_v3 = vpop.permute.xlu1 %270  ;;  %1580 = vset.pattern.permute.xlu0 %v2629_v48 }
  0xde   :  { %974 = vperm.xlu0 %1580, %v1757_v13  }
  0xdf   :  { %v1966_v51 = vpop.permute.xlu0 %694 }
  0xe0   :  { %2698 = vst [vmem:[#allocation17_spill] sm:$0xff] %v1966_v51 }
  0xe1   :  { %1556 = vset.pattern.permute.xlu1 %v1627_v12  ;;  %v53_v12 = vlaneseq }
  0xe2   :  { %634 = vperm.xlu1 %1556, %v1724_v7   ;;  %v1970_v10 = vpop.permute.xlu1 %290  ;;  %1581 = vset.pattern.permute.xlu0 %v2634_v41 }
  0xe3   :  { %998 = vperm.xlu0 %1581, %v1724_v7   ;;  %v54_v20 = vshrl.u32 %v53_v12, 7 }
  0xe4   :  { %v1974_v34 = vpop.permute.xlu0 %230 }
  0xe5   :  { %v1997_v16 = vsub.s32 0, %v54_v20  ;;  %v2026_v47 = vsub.s32 3, %v54_v20  ;;  %v2072_v54 = vsub.s32 6, %v54_v20 }
  0xe6   :  { %642 = vperm.xlu1 %1556, %v1731_v8   ;;  %v1977_v48 = vpop.permute.xlu1 %294 }
  0xe7   :  { %2699 = vst [vmem:[#allocation18_spill] sm:$0xff] %v1977_v48  ;;  %1010 = vperm.xlu0 %1581, %v1746_v11   ;;  %v2016_v48 = vsub.s32 2, %v54_v20  ;;  %2705 = vst [vmem:[#allocation23_spill] sm:$0xff] %v2026_v47 }
  0xe8   :  { %v1980_v0 = vpop.permute.xlu0 %242 }
  0xe9   :  { %2703 = vst [vmem:[#allocation22_spill] sm:$0xff] %v2016_v48 }
  0xea   :  { %646 = vperm.xlu1 %1556, %v1746_v11  }
  0xeb   :  { %v1983_v30 = vpop.permute.xlu1 %314  ;;  %1584 = vset.pattern.permute.xlu0 %v2640_v22  ;;  %v1999_v22 = vsub.s32 1, %v54_v20 }
  0xec   :  { %1030 = vperm.xlu0 %1584, %v1757_v13   ;;  %v1987_v41 = vpop.permute.xlu0 %718 }
  0xed   :  { %2700 = vst [vmem:[#allocation19_spill] sm:$0xff] %v1987_v41 }
  0xee   :  { %1558 = vset.pattern.permute.xlu1 %v1628_v14  ;;  %v23_v14 = vld [vmem:[%s2623_s0] sm:$0xff] }
  0xef   :  { %666 = vperm.xlu1 %1558, %v1757_v13   ;;  %v1991_v19 = vpop.permute.xlu1 %322  ;;  %v2041_v29 = vrot.slane %v23_v14, %v2026_v47  ;;  %v2088_v40 = vrot.slane %v23_v14, %v2072_v54 }
  0xf0   :  { %2701 = vst [vmem:[#allocation20_spill] sm:$0xff] %v1991_v19  ;;  %1585 = vset.pattern.permute.xlu0 %v2642_v18  ;;  %v1994_v17 = vpop.permute.xlu0 %730  ;;  %v2011_v18 = vrot.slane %v23_v14, %v1997_v16  ;;  %v2014_v19 = vrot.slane %v23_v14, %v1999_v22 }
  0xf1   :  { %2702 = vst [vmem:[#allocation21_spill] sm:$0xff] %v1994_v17  ;;  %1054 = vperm.xlu0 %1585, %v1724_v7   ;;  %v2043_v17 = vsub.s32 4, %v54_v20 }
  0xf2   :  { %v57_v59 = vmul.f32 %v2011_v18, %v1816_v23  ;;  %v81_v55 = vmul.f32 %v2014_v19, %v1846_v33  ;;  %v84_v33 = vmul.f32 %v2014_v19, %v1854_v36  ;;  %v60_v41 = vmul.f32 %v2011_v18, %v1820_v24 }
  0xf3   :  { %670 = vperm.xlu1 %1558, %v1731_v8   ;;  %v2002_v15 = vpop.permute.xlu1 %326  ;;  %2709 = vst [vmem:[#allocation27_spill] sm:$0xff] %v2043_v17  ;;  %v2054_v36 = vsub.s32 5, %v54_v20  ;;  %v2061_v56 = vrot.slane %v23_v14, %v2043_v17 }
  0xf4   :  { %v85_v23 = vadd.f32 %v81_v55, %v57_v59  ;;  %v137_v55 = vmul.f32 %v2041_v29, %v1892_v49  ;;  %v88_v59 = vadd.f32 %v84_v33, %v60_v41  ;;  %v140_v49 = vmul.f32 %v2041_v29, %v1901_v52 }
  0xf5   :  { %1066 = vperm.xlu0 %1585, %v1746_v11   ;;  %v2008_v12 = vpop.permute.xlu0 %262  ;;  %2710 = vst [vmem:[#allocation28_spill] sm:$0xff] %v2054_v36  ;;  %v2070_v51 = vrot.slane %v23_v14, %v2054_v36  ;;  %v2711_v41 = vmov 7  }
  0xf7   :  { %1560 = vset.pattern.permute.xlu1 %v2704_v2  ;;  %v2033_v2 = vrot.slane %v23_v14, %v2016_v48  ;;  %v193_v33 = vmul.f32 %v2070_v51, %v1932_v62 }
  0xf8   :  { %690 = vperm.xlu1 %1560, %v1724_v7   ;;  %v2020_v4 = vpop.permute.xlu1 %346 }
  0xf9   :  { %1588 = vset.pattern.permute.xlu0 %v2643_v42  ;;  %v2029_v35 = vpop.permute.xlu0 %750  ;;  %2707 = vst [vmem:[#allocation25_spill] sm:$0xff] %v2033_v2  ;;  %v2644_v42 = vmov 21  }
  0xfa   :  { %2706 = vst [vmem:[#allocation24_spill] sm:$0xff] %v2029_v35  ;;  %1086 = vperm.xlu0 %1588, %v1757_v13  }
  0xfc   :  { %698 = vperm.xlu1 %1560, %v1731_v8   ;;  %v2036_v21 = vpop.permute.xlu1 %350 }
  0xfd   :  { %2708 = vst [vmem:[#allocation26_spill] sm:$0xff] %v2036_v21  ;;  %v109_v21 = vmul.f32 %v2033_v2, %v1843_v32 }
  0xfe   :  { %1589 = vset.pattern.permute.xlu0 %v2644_v42  ;;  %v2046_v9 = vpop.permute.xlu0 %286  ;;  %v112_v42 = vmul.f32 %v2033_v2, %v1856_v37  ;;  %v2075_v37 = vsub.s32 7, %v54_v20 }
  0xff   :  { %1110 = vperm.xlu0 %1589, %v1724_v7   ;;  %v113_v24 = vadd.f32 %v109_v21, %v85_v23  ;;  %v165_v23 = vmul.f32 %v2061_v56, %v1876_v44  ;;  %v82_v44 = vmul.f32 %v2014_v19, %v1828_v27  ;;  %v2111_v27 = vld [vmem:[%s2623_s0 + $0x8] sm:$0xff] }
 0x100   :  { %702 = vperm.xlu1 %1560, %v1746_v11   ;;  %v116_v21 = vadd.f32 %v112_v42, %v88_v59  ;;  %v58_v42 = vmul.f32 %v2011_v18, %v1822_v25  ;;  %v2096_v62 = vrot.slane %v23_v14, %v2075_v37  ;;  %v168_v59 = vmul.f32 %v2061_v56, %v1894_v50 }
 0x101   :  { %v2063_v35 = vpop.permute.xlu1 %370  ;;  %v141_v5 = vadd.f32 %v137_v55, %v113_v24  ;;  %v110_v25 = vmul.f32 %v2033_v2, %v1873_v43  ;;  %v221_v50 = vmul.f32 %v2088_v40, %v1915_v57  ;;  %v2122_v43 = vrot.slane %v2111_v27, %v1997_v16 }
 0x102   :  { %v2065_v32 = vpop.permute.xlu0 %298  ;;  %v144_v24 = vadd.f32 %v140_v49, %v116_v21 }
 0x103   :  { %1122 = vperm.xlu0 %1589, %v1746_v11   ;;  %v169_v20 = vadd.f32 %v165_v23, %v141_v5  ;;  %v196_v5 = vmul.f32 %v2070_v51, %v1940_v1  ;;  %v249_v1 = vmul.f32 %v2096_v62, %v1974_v34  ;;  %v86_v23 = vadd.f32 %v82_v44, %v58_v42 }
 0x104   :  { %1562 = vset.pattern.permute.xlu1 %v2711_v41  ;;  %v172_v21 = vadd.f32 %v168_v59, %v144_v24  ;;  %2713 = vst [vmem:[#allocation30_spill] sm:$0xff] %v2122_v43  ;;  %v224_v34 = vmul.f32 %v2088_v40, %v1929_v61  ;;  %v2133_v24 = vrot.slane %v2111_v27, %v1999_v22 }
 0x105   :  { %722 = vperm.xlu1 %1562, %v1757_v13   ;;  %v2083_v52 = vpop.permute.xlu1 %378  ;;  %v197_v49 = vadd.f32 %v193_v33, %v169_v20  ;;  %v2658_v33 = vmov 23   ;;  %v114_v2 = vadd.f32 %v110_v25, %v86_v23  ;;  %v252_v44 = vmul.f32 %v2096_v62, %v1980_v0 }
 0x106   :  { %2712 = vst [vmem:[#allocation29_spill] sm:$0xff] %v2083_v52  ;;  %v2085_v55 = vpop.permute.xlu0 %774  ;;  %v200_v20 = vadd.f32 %v196_v5, %v172_v21  ;;  %v2714_v52 = vmov 8   ;;  %2715 = vst [vmem:[#allocation31_spill] sm:$0xff] %v2133_v24  ;;  %v277_v5 = vmul.f32 %v2122_v43, %v1949_v6  ;;  %v305_v61 = vmul.f32 %v2133_v24, %v2046_v9 }
 0x107   :  { %1592 = vset.pattern.permute.xlu0 %v2645_v60  ;;  %v225_v60 = vadd.f32 %v221_v50, %v197_v49  ;;  %v166_v49 = vmul.f32 %v2061_v56, %v1918_v58  ;;  %v2657_v23 = vmov 24  }
 0x108   :  { %1142 = vperm.xlu0 %1592, %v1757_v13   ;;  %v228_v25 = vadd.f32 %v224_v34, %v200_v20  ;;  %v194_v20 = vmul.f32 %v2070_v51, %v1903_v53  ;;  %v222_v34 = vmul.f32 %v2088_v40, %v1959_v46 }
 0x109   :  { %726 = vperm.xlu1 %1562, %v1731_v8   ;;  %v2104_v41 = vpop.permute.xlu1 %382  ;;  %v253_v42 = vadd.f32 %v249_v1, %v225_v60  ;;  %v280_v1 = vmul.f32 %v2122_v43, %v1962_v3 }
 0x10a   :  { %v2113_v14 = vpop.permute.xlu0 %786  ;;  %v256_v50 = vadd.f32 %v252_v44, %v228_v25 }
 0x10b   :  { %v281_v58 = vadd.f32 %v277_v5, %v253_v42  ;;  %v2170_v42 = vrot.slane %v2111_v27, %v2026_v47 }
 0x10c   :  { %1593 = vset.pattern.permute.xlu0 %v2658_v33  ;;  %v2659_v33 = vmov 31  }
 0x10d   :  { %1564 = vset.pattern.permute.xlu1 %v2714_v52  ;;  %1166 = vperm.xlu0 %1593, %v1724_v7   ;;  %v138_v52 = vmul.f32 %v2041_v29, %v1863_v39  ;;  %v2151_v39 = vrot.slane %v2111_v27, %v2016_v48  ;;  %v309_v9 = vadd.f32 %v305_v61, %v281_v58  ;;  %v2719_v61 = vmov 9  }
 0x10e   :  { %746 = vperm.xlu1 %1564, %v1724_v7   ;;  %v2127_v57 = vpop.permute.xlu1 %402  ;;  %2718 = vst [vmem:[#allocation34_spill] sm:$0xff] %v2170_v42 }
 0x10f   :  { %v319_v59 = vpop.permute.xlu0 %318  ;;  %v142_v60 = vadd.f32 %v138_v52, %v114_v2  ;;  %2717 = vst [vmem:[#allocation33_spill] sm:$0xff] %v2151_v39  ;;  %v308_v2 = vmul.f32 %v2133_v24, %v2065_v32  ;;  %v333_v3 = vmul.f32 %v2151_v39, %v1983_v30  ;;  %v284_v32 = vadd.f32 %v280_v1, %v256_v50 }
 0x110   :  { %v336_v30 = vmul.f32 %v2151_v39, %v2002_v15  ;;  %v278_v1 = vmul.f32 %v2122_v43, %v2008_v12  ;;  %v334_v12 = vmul.f32 %v2151_v39, %v319_v59 }
 0x111   :  { %1178 = vperm.xlu0 %1593, %v1746_v11   ;;  %v170_v6 = vadd.f32 %v166_v49, %v142_v60  ;;  %v312_v53 = vadd.f32 %v308_v2, %v284_v32  ;;  %v337_v5 = vadd.f32 %v333_v3, %v309_v9  ;;  %v2652_v60 = vmov 25  }
 0x112   :  { %754 = vperm.xlu1 %1564, %v1731_v8   ;;  %v2147_v0 = vpop.permute.xlu1 %406 }
 0x113   :  { %2716 = vst [vmem:[#allocation32_spill] sm:$0xff] %v2147_v0  ;;  %v2153_v21 = vpop.permute.xlu0 %806  ;;  %v198_v52 = vadd.f32 %v194_v20, %v170_v6  ;;  %v250_v6 = vmul.f32 %v2096_v62, %v1936_v63  ;;  %v340_v2 = vadd.f32 %v336_v30, %v312_v53  ;;  %v306_v63 = vmul.f32 %v2133_v24, %v1970_v10 }
 0x114   :  { %v2651_v53 = vmov 26   ;;  %v362_v30 = vmul.f32 %v2170_v42, %v2020_v4  ;;  %v2209_v10 = vrot.slane %v2111_v27, %v2043_v17 }
 0x115   :  { %1596 = vset.pattern.permute.xlu0 %v2657_v23  ;;  %v226_v25 = vadd.f32 %v222_v34, %v198_v52 }
 0x116   :  { %758 = vperm.xlu1 %1564, %v1746_v11   ;;  %1198 = vperm.xlu0 %1596, %v1757_v13   ;;  %2722 = vst [vmem:[#allocation36_spill] sm:$0xff] %v2209_v10  ;;  %v389_v0 = vmul.f32 %v2209_v10, %v2063_v35 }
 0x117   :  { %v2172_v44 = vpop.permute.xlu1 %426  ;;  %v254_v34 = vadd.f32 %v250_v6, %v226_v25  ;;  %v2649_v6 = vmov 27  }
 0x118   :  { %v343_v49 = vpop.permute.xlu0 %342 }
 0x119   :  { %v361_v46 = vmul.f32 %v2170_v42, %v343_v49  ;;  %v282_v32 = vadd.f32 %v278_v1, %v254_v34  ;;  %v2721_v49 = vmov 10   ;;  %v2647_v34 = vmov 28  }
 0x11a   :  { %1566 = vset.pattern.permute.xlu1 %v2719_v61  ;;  %1597 = vset.pattern.permute.xlu0 %v2652_v60  ;;  %v2655_v60 = vmov 30  }
 0x11b   :  { %v2179_v58 = vadd.f32 %v361_v46, %v337_v5  ;;  %778 = vperm.xlu1 %1566, %v1757_v13   ;;  %v2182_v50 = vpop.permute.xlu1 %434  ;;  %1222 = vperm.xlu0 %1597, %v1724_v7   ;;  %v310_v5 = vadd.f32 %v306_v63, %v282_v32  ;;  %v2724_v63 = vmov 11  }
 0x11c   :  { %2720 = vst [vmem:[#allocation35_spill] sm:$0xff] %v2182_v50  ;;  %v355_v9 = vpop.permute.xlu0 %354 }
 0x11d   :  { %v364_v20 = vmul.f32 %v2170_v42, %v355_v9  ;;  %v338_v61 = vadd.f32 %v334_v12, %v310_v5  ;;  %v392_v5 = vmul.f32 %v2209_v10, %v2104_v41 }
 0x11f   :  { %v368_v15 = vadd.f32 %v364_v20, %v340_v2  ;;  %782 = vperm.xlu1 %1566, %v1731_v8   ;;  %v2191_v3 = vpop.permute.xlu1 %438  ;;  %1234 = vperm.xlu0 %1597, %v1746_v11   ;;  %v366_v9 = vadd.f32 %v362_v30, %v338_v61  ;;  %v2235_v61 = vrot.slane %v2111_v27, %v2054_v36 }
 0x120   :  { %v2194_v52 = vpop.permute.xlu0 %830 }
 0x121   :  { %2726 = vst [vmem:[#allocation39_spill] sm:$0xff] %v2235_v61 }
 0x123   :  { %1568 = vset.pattern.permute.xlu1 %v2721_v49  ;;  %1600 = vset.pattern.permute.xlu0 %v2651_v53 }
 0x124   :  { %802 = vperm.xlu1 %1568, %v1724_v7   ;;  %v459_v46 = vpop.permute.xlu1 %458  ;;  %1254 = vperm.xlu0 %1600, %v1757_v13   ;;  %v2203_v25 = vpop.permute.xlu0 %842 }
 0x128   :  { %810 = vperm.xlu1 %1568, %v1731_v8   ;;  %v2212_v59 = vpop.permute.xlu1 %462  ;;  %1601 = vset.pattern.permute.xlu0 %v2649_v6  ;;  %v2728_v6 = vmov 12  }
 0x129   :  { %2723 = vst [vmem:[#allocation37_spill] sm:$0xff] %v2212_v59  ;;  %1278 = vperm.xlu0 %1601, %v1724_v7   ;;  %v375_v1 = vpop.permute.xlu0 %374 }
 0x12a   :  { %v390_v2 = vmul.f32 %v2209_v10, %v375_v1  ;;  %v2653_v1 = vmov 29  }
 0x12c   :  { %v394_v20 = vadd.f32 %v390_v2, %v366_v9  ;;  %814 = vperm.xlu1 %1568, %v1746_v11   ;;  %v396_v2 = vadd.f32 %v392_v5, %v368_v15  ;;  %v2261_v5 = vrot.slane %v2111_v27, %v2072_v54 }
 0x12d   :  { %v2218_v4 = vpop.permute.xlu1 %487  ;;  %1603 = vset.pattern.permute.xlu0 %v2647_v34  ;;  %v2221_v32 = vpop.permute.xlu0 %862 }
 0x12e   :  { %1306 = vperm.xlu0 %1603, %v1724_v7   ;;  %2729 = vst [vmem:[#allocation41_spill] sm:$0xff] %v2261_v5 }
 0x130   :  { %1570 = vset.pattern.permute.xlu1 %v2724_v63 }
 0x131   :  { %834 = vperm.xlu1 %1570, %v1757_v13   ;;  %v2226_v12 = vpop.permute.xlu1 %497 }
 0x132   :  { %2725 = vst [vmem:[#allocation38_spill] sm:$0xff] %v2226_v12  ;;  %1314 = vperm.xlu0 %1603, %v1731_v8   ;;  %v2229_v49 = vpop.permute.xlu0 %398  ;;  %v2731_v12 = vmov 13  }
 0x133   :  { %v417_v42 = vmul.f32 %v2235_v61, %v2229_v49  ;;  %v393_v49 = vadd.f32 %v389_v0, %v2179_v58 }
 0x135   :  { %838 = vperm.xlu1 %1570, %v1731_v8   ;;  %v2238_v30 = vpop.permute.xlu1 %502 }
 0x136   :  { %2727 = vst [vmem:[#allocation40_spill] sm:$0xff] %v2238_v30  ;;  %1607 = vset.pattern.permute.xlu0 %v2653_v1  ;;  %v411_v9 = vpop.permute.xlu0 %410 }
 0x137   :  { %v420_v63 = vmul.f32 %v2235_v61, %v411_v9  ;;  %1338 = vperm.xlu0 %1607, %v1757_v13   ;;  %v2265_v9 = vrot.slane %v2111_v27, %v2075_v37 }
 0x139   :  { %v424_v34 = vadd.f32 %v420_v63, %v396_v2  ;;  %1572 = vset.pattern.permute.xlu1 %v2728_v6  ;;  %v2244_v41 = vpop.permute.xlu1 %528  ;;  %v418_v6 = vmul.f32 %v2235_v61, %v2127_v57  ;;  %2730 = vst [vmem:[#allocation42_spill] sm:$0xff] %v2265_v9  ;;  %v474_v57 = vmul.f32 %v2265_v9, %v459_v46 }
 0x13a   :  { %858 = vperm.xlu1 %1572, %v1724_v7   ;;  %v2247_v53 = vpop.permute.xlu0 %886 }
 0x13b   :  { %1610 = vset.pattern.permute.xlu0 %v2655_v60  ;;  %v422_v60 = vadd.f32 %v418_v6, %v394_v20 }
 0x13c   :  { %1362 = vperm.xlu0 %1610, %v1724_v7  }
 0x13d   :  { %v2251_v1 = vpop.permute.xlu1 %538 }
 0x13e   :  { %866 = vperm.xlu1 %1572, %v1731_v8   ;;  %v2254_v15 = vpop.permute.xlu0 %898 }
 0x140   :  { %1370 = vperm.xlu0 %1610, %v1731_v8  }
 0x142   :  { %870 = vperm.xlu1 %1572, %v1746_v11   ;;  %v2268_v2 = vpop.permute.xlu1 %554 }
 0x143   :  { %v431_v63 = vpop.permute.xlu0 %430 }
 0x144   :  { %v446_v23 = vmul.f32 %v2261_v5, %v431_v63  ;;  %1614 = vset.pattern.permute.xlu0 %v2659_v33 }
 0x145   :  { %1394 = vperm.xlu0 %1614, %v1757_v13  }
 0x146   :  { %v450_v30 = vadd.f32 %v446_v23, %v422_v60  ;;  %1574 = vset.pattern.permute.xlu1 %v2731_v12  ;;  %v2275_v27 = vpop.permute.xlu1 %558  ;;  %v2732_v23 = vmov 0   ;;  %v448_v12 = vmul.f32 %v2261_v5, %v2191_v3 }
 0x147   :  { %890 = vperm.xlu1 %1574, %v1757_v13   ;;  %v919_v59 = vpop.permute.xlu0 %918 }
 0x148   :  { %v478_v50 = vadd.f32 %v474_v57, %v450_v30  ;;  %v2734_v57 = vmov 14  }
 0x149   :  { %1402 = vperm.xlu0 %1614, %v1746_v11  }
 0x14a   :  { %v506_v20 = vadd.f32 %v1826_v26, %v478_v50 }
 0x14b   :  { %894 = vperm.xlu1 %1574, %v1731_v8   ;;  %v2281_v6 = vpop.permute.xlu1 %578 }
 0x14c   :  { %vm510_vm0 = vcmp.gt.f32.partialorder %v506_v20, 0.0  ;;  %v514_v63 = vmul.f32 0.01, %v506_v20  ;;  %v455_v46 = vpop.permute.xlu0 %454 }
 0x14d   :  { %1618 = vset.pattern.permute.xlu0 %v2732_v23 }
 0x14e   :  { %v2284_v60 = vsel %vm510_vm0, %v506_v20, %v514_v63 }
 0x14f   :  { %v2290_v30 = vrot.slane %v2284_v60, %v2072_v54  ;;  %1576 = vset.pattern.permute.xlu1 %v2734_v57  ;;  %v2293_v26 = vpop.permute.xlu1 %586  ;;  %v2298_v33 = vrot.slane %v2284_v60, %v2016_v48  ;;  %v2302_v20 = vrot.slane %v2284_v60, %v2026_v47  ;;  %v2306_v3 = vrot.slane %v2284_v60, %v2043_v17 }
 0x150   :  { %914 = vperm.xlu1 %1576, %v1724_v7   ;;  %v467_v50 = vpop.permute.xlu0 %466  ;;  %v452_v57 = vadd.f32 %v448_v12, %v424_v34  ;;  %v2330_v34 = vrot.slane %v2284_v60, %v2075_v37  ;;  %v421_v12 = vadd.f32 %v417_v42, %v393_v49 }
 0x151   :  { %2733 = vst [vmem:[#allocation43_spill] sm:$0xff] %v2290_v30  ;;  %v2309_v63 = vmul.f32 %v2290_v30, %v919_v59  ;;  %v476_v23 = vmul.f32 %v2265_v9, %v467_v50  ;;  %v2318_v39 = vmul.f32 %v2298_v33, %v2153_v21  ;;  %v2322_v24 = vmul.f32 %v2302_v20, %v2194_v52 }
 0x152   :  { %2737 = vst [vmem:[#allocation46_spill] sm:$0xff] %v2330_v34  ;;  %v2334_v35 = vmul.f32 %v2302_v20, %v2203_v25  ;;  %v2340_v52 = vmul.f32 %v2306_v3, %v2221_v32  ;;  %v445_v50 = vmul.f32 %v2261_v5, %v2172_v44  ;;  %v2740_v32 = vmov 15   ;;  %v2748_v5 = vld [vmem:[#allocation8_spill] sm:$0xff] }
 0x153   :  { %2735 = vst [vmem:[#allocation44_spill] sm:$0xff] %v2309_v63  ;;  %v2324_v43 = vadd.f32 %v476_v23, %v452_v57  ;;  %v2326_v59 = vpop.permute.xlu1 %590  ;;  %v473_v57 = vmul.f32 %v2265_v9, %v455_v46  ;;  %v2359_v44 = vrot.slane %v2284_v60, %v2054_v36 }
 0x154   :  { %922 = vperm.xlu1 %1576, %v1731_v8   ;;  %v943_v21 = vpop.permute.xlu0 %942  ;;  %v449_v58 = vadd.f32 %v445_v50, %v421_v12  ;;  %v2742_v12 = vmov 16  }
 0x155   :  { %2736 = vst [vmem:[#allocation45_spill] sm:$0xff] %v2324_v43  ;;  %v2343_v23 = vmul.f32 %v2330_v34, %v943_v21  ;;  %2741 = vst [vmem:[#allocation49_spill] sm:$0xff] %v2359_v44  ;;  %v2364_v21 = vmul.f32 %v2359_v44, %v2247_v53 }
 0x156   :  { %v477_v30 = vadd.f32 %v473_v57, %v449_v58 }
 0x157   :  { %2738 = vst [vmem:[#allocation47_spill] sm:$0xff] %v2343_v23 }
 0x158   :  { %926 = vperm.xlu1 %1576, %v1746_v11   ;;  %v611_v25 = vpop.permute.xlu1 %610  ;;  %v955_v0 = vpop.permute.xlu0 %954  ;;  %v505_v42 = vadd.f32 %v2218_v4, %v477_v30  ;;  %v2371_v4 = vmul.f32 %v2359_v44, %v2254_v15 }
 0x159   :  { %v2350_v43 = vmul.f32 %v2330_v34, %v955_v0  ;;  %v2744_v34 = vmov 17  }
 0x15a   :  { %v513_v49 = vmul.f32 0.01, %v505_v42  ;;  %vm509_vm1 = vcmp.gt.f32.partialorder %v505_v42, 0.0  ;;  %2743 = vst [vmem:[#allocation50_spill] sm:$0xff] %v2371_v4 }
 0x15b   :  { %2739 = vst [vmem:[#allocation48_spill] sm:$0xff] %v2350_v43 }
 0x15c   :  { %1578 = vset.pattern.permute.xlu1 %v2740_v32  ;;  %v2353_v61 = vpop.permute.xlu1 %614  ;;  %v517_v30 = vsel %vm509_vm1, %v505_v42, %v513_v49 }
 0x15d   :  { %946 = vperm.xlu1 %1578, %v1757_v13   ;;  %v544_v0 = vrot.slane %v517_v30, %v1997_v16  ;;  %v568_v53 = vrot.slane %v517_v30, %v1999_v22  ;;  %v596_v15 = vrot.slane %v517_v30, %v2016_v48  ;;  %v624_v49 = vrot.slane %v517_v30, %v2026_v47 }
 0x15e   :  { %v680_v47 = vrot.slane %v517_v30, %v2054_v36  ;;  %v2745_v48 = vmov 18   ;;  %v708_v23 = vrot.slane %v517_v30, %v2072_v54 }
 0x15f   :  { %v546_v32 = vmul.f32 %v544_v0, %v2244_v41  ;;  %v569_v43 = vmul.f32 %v568_v53, %v1860_v38  ;;  %v597_v38 = vmul.f32 %v596_v15, %v2281_v6  ;;  %v625_v10 = vmul.f32 %v624_v49, %v2748_v5  ;;  %v2424_v5 = vld [vmem:[%s2622_s3 + $0x18] sm:$0xff] }
 0x161   :  { %950 = vperm.xlu1 %1578, %v1731_v8   ;;  %v635_v46 = vpop.permute.xlu1 %634 }
 0x165   :  { %1579 = vset.pattern.permute.xlu1 %v2742_v12  ;;  %v2367_v50 = vpop.permute.xlu1 %642  ;;  %v570_v12 = vmul.f32 %v568_v53, %v2268_v2  ;;  %v2394_v2 = vld [vmem:[%s2622_s3 + $0x10] sm:$0xff] }
 0x166   :  { %970 = vperm.xlu1 %1579, %v1724_v7  }
 0x167   :  { %v574_v42 = vadd.f32 %v570_v12, %v546_v32  ;;  %v626_v32 = vmul.f32 %v624_v49, %v611_v25  ;;  %v547_v25 = vmul.f32 %v544_v0, %v1840_v31 }
 0x169   :  { %v2374_v57 = vpop.permute.xlu1 %646 }
 0x16a   :  { %978 = vperm.xlu1 %1579, %v1731_v8   ;;  %v598_v8 = vmul.f32 %v596_v15, %v1880_v45 }
 0x16c   :  { %v602_v41 = vadd.f32 %v598_v8, %v574_v42  ;;  %v2404_v42 = vld [vmem:[%s2622_s3] sm:$0xff]  ;;  %v571_v8 = vmul.f32 %v568_v53, %v2275_v27 }
 0x16e   :  { %982 = vperm.xlu1 %1579, %v1746_v11   ;;  %v667_v58 = vpop.permute.xlu1 %666  ;;  %v545_v11 = vmul.f32 %v544_v0, %v1832_v28  ;;  %v630_v45 = vadd.f32 %v626_v32, %v602_v41  ;;  %v548_v32 = vmul.f32 %v544_v0, %v2251_v1  ;;  %v575_v31 = vadd.f32 %v571_v8, %v547_v25 }
 0x16f   :  { %v682_v41 = vmul.f32 %v680_v47, %v667_v58  ;;  %v599_v58 = vmul.f32 %v596_v15, %v2293_v26  ;;  %v736_v0 = vrot.slane %v517_v30, %v2075_v37 }
 0x170   :  { %v573_v12 = vadd.f32 %v569_v43, %v545_v11  ;;  %v2746_v43 = vld [vmem:[#allocation12_spill] sm:$0xff] }
 0x172   :  { %1582 = vset.pattern.permute.xlu1 %v2744_v34  ;;  %v2384_v7 = vpop.permute.xlu1 %670 }
 0x173   :  { %1002 = vperm.xlu1 %1582, %v1757_v13   ;;  %v652_v13 = vrot.slane %v517_v30, %v2043_v17  ;;  %v601_v17 = vadd.f32 %v597_v38, %v573_v12  ;;  %v600_v12 = vmul.f32 %v596_v15, %v2326_v59  ;;  %v2750_v38 = vld [vmem:[#allocation14_spill] sm:$0xff] }
 0x174   :  { %v681_v25 = vmul.f32 %v680_v47, %v2750_v38 }
 0x175   :  { %v654_v11 = vmul.f32 %v652_v13, %v2746_v43  ;;  %v653_v63 = vmul.f32 %v652_v13, %v635_v46  ;;  %v629_v4 = vadd.f32 %v625_v10, %v601_v17  ;;  %v2749_v43 = vld [vmem:[#allocation17_spill] sm:$0xff]  ;;  %v627_v10 = vmul.f32 %v624_v49, %v2353_v61 }
 0x176   :  { %v710_v1 = vmul.f32 %v708_v23, %v2749_v43  ;;  %v655_v59 = vmul.f32 %v652_v13, %v2367_v50 }
 0x177   :  { %1006 = vperm.xlu1 %1582, %v2394_v2   ;;  %v691_v34 = vpop.permute.xlu1 %690  ;;  %v658_v6 = vadd.f32 %v654_v11, %v630_v45  ;;  %v657_v45 = vadd.f32 %v653_v63, %v629_v4  ;;  %v2751_v4 = vld [vmem:[#allocation24_spill] sm:$0xff]  ;;  %v2752_v11 = vld [vmem:[#allocation10_spill] sm:$0xff] }
 0x178   :  { %v709_v8 = vmul.f32 %v708_v23, %v691_v34  ;;  %v2438_v34 = vld [vmem:[%s2622_s3 + $0x8] sm:$0xff] }
 0x179   :  { %v686_v44 = vadd.f32 %v682_v41, %v658_v6  ;;  %v628_v41 = vmul.f32 %v624_v49, %v2752_v11  ;;  %v2753_v6 = vmov 19  }
 0x17b   :  { %1583 = vset.pattern.permute.xlu1 %v2745_v48  ;;  %v699_v28 = vpop.permute.xlu1 %698  ;;  %v2747_v48 = vld [vmem:[#allocation5_spill] sm:$0xff]  ;;  %v714_v26 = vadd.f32 %v710_v1, %v686_v44  ;;  %v683_v44 = vmul.f32 %v680_v47, %v2384_v7  ;;  %v1418_v7 = vld [vmem:[%s2624_s4 + $0x8] sm:$0xff] }
 0x17c   :  { %1026 = vperm.xlu1 %1583, %v2404_v42   ;;  %v572_v36 = vmul.f32 %v568_v53, %v2747_v48  ;;  %v764_v53 = vrot.slane %v2284_v60, %v1997_v16  ;;  %v685_v48 = vadd.f32 %v681_v25, %v657_v45  ;;  %1428 = vperm.xlu0 %1618, %v1418_v7   ;;  %v2759_v7 = vmov 22  }
 0x17e   :  { %v576_v27 = vadd.f32 %v572_v36, %v548_v32  ;;  %v603_v36 = vadd.f32 %v599_v58, %v575_v31  ;;  %v766_v15 = vmul.f32 %v764_v53, %v2751_v4  ;;  %v656_v32 = vmul.f32 %v652_v13, %v2374_v57  ;;  %v2754_v13 = vld [vmem:[#allocation19_spill] sm:$0xff] }
 0x17f   :  { %v703_v9 = vpop.permute.xlu1 %702  ;;  %v713_v58 = vadd.f32 %v709_v8, %v685_v48  ;;  %v711_v57 = vmul.f32 %v708_v23, %v699_v28  ;;  %v737_v1 = vmul.f32 %v736_v0, %v2754_v13  ;;  %v1457_v13 = vld [vmem:[%s2625_s5] sm:$0xff] }
 0x180   :  { %1034 = vperm.xlu1 %1583, %v2394_v2   ;;  %v604_v30 = vadd.f32 %v600_v12, %v576_v27  ;;  %v631_v61 = vadd.f32 %v627_v10, %v603_v36  ;;  %v792_v12 = vrot.slane %v2284_v60, %v1999_v22  ;;  %1463 = vperm.xlu0 %1618, %v1457_v13  }
 0x182   :  { %v632_v27 = vadd.f32 %v628_v41, %v604_v30  ;;  %v659_v49 = vadd.f32 %v655_v59, %v631_v61  ;;  %v741_v30 = vadd.f32 %v737_v1, %v713_v58  ;;  %v793_v60 = vmul.f32 %v792_v12, %v2085_v55 }
 0x183   :  { %v2756_v59 = vmov 20   ;;  %v796_v55 = vmul.f32 %v792_v12, %v2113_v14 }
 0x184   :  { %1038 = vperm.xlu1 %1583, %v2424_v5   ;;  %v723_v17 = vpop.permute.xlu1 %722  ;;  %v660_v43 = vadd.f32 %v656_v32, %v632_v27  ;;  %v687_v45 = vadd.f32 %v683_v44, %v659_v49  ;;  %v2757_v32 = vld [vmem:[#allocation21_spill] sm:$0xff]  ;;  %v2758_v49 = vmov 21  }
 0x185   :  { %v738_v46 = vmul.f32 %v736_v0, %v723_v17  ;;  %v2755_v17 = vld [vmem:[#allocation15_spill] sm:$0xff] }
 0x186   :  { %v684_v36 = vmul.f32 %v680_v47, %v2755_v17  ;;  %v715_v38 = vadd.f32 %v711_v57, %v687_v45 }
 0x187   :  { %v742_v63 = vadd.f32 %v738_v46, %v714_v26  ;;  %v712_v26 = vmul.f32 %v708_v23, %v703_v9  ;;  %v740_v9 = vmul.f32 %v736_v0, %v2757_v32 }
 0x188   :  { %1586 = vset.pattern.permute.xlu1 %v2753_v6  ;;  %v727_v31 = vpop.permute.xlu1 %726  ;;  %v688_v25 = vadd.f32 %v684_v36, %v660_v43 }
 0x189   :  { %1058 = vperm.xlu1 %1586, %v2438_v34   ;;  %v770_v50 = vadd.f32 %v766_v15, %v742_v63  ;;  %v739_v46 = vmul.f32 %v736_v0, %v727_v31 }
 0x18a   :  { %v716_v4 = vadd.f32 %v712_v26, %v688_v25 }
 0x18b   :  { %v743_v15 = vadd.f32 %v739_v46, %v715_v38 }
 0x18c   :  { %v744_v48 = vadd.f32 %v740_v9, %v716_v4 }
 0x18d   :  { %1062 = vperm.xlu1 %1586, %v2394_v2   ;;  %v747_v10 = vpop.permute.xlu1 %746 }
 0x18e   :  { %v765_v28 = vmul.f32 %v764_v53, %v747_v10 }
 0x190   :  { %v769_v8 = vadd.f32 %v765_v28, %v741_v30 }
 0x191   :  { %1587 = vset.pattern.permute.xlu1 %v2756_v59  ;;  %v755_v63 = vpop.permute.xlu1 %754  ;;  %v2761_v59 = vld [vmem:[#allocation3_spill] sm:$0xff] }
 0x192   :  { %v767_v11 = vmul.f32 %v764_v53, %v755_v63  ;;  %1082 = vperm.xlu1 %1587, %v2404_v42   ;;  %v797_v47 = vadd.f32 %v793_v60, %v769_v8  ;;  %v2760_v8 = vmov 23   ;;  %v83_v63 = vmul.f32 %v2014_v19, %v2761_v59  ;;  %v2780_v59 = vld [vmem:[#allocation26_spill] sm:$0xff] }
 0x194   :  { %v771_v41 = vadd.f32 %v767_v11, %v743_v15  ;;  %v2762_v15 = vld [vmem:[#allocation2_spill] sm:$0xff] }
 0x195   :  { %v759_v23 = vpop.permute.xlu1 %758  ;;  %v59_v11 = vmul.f32 %v2011_v18, %v2762_v15 }
 0x196   :  { %v768_v6 = vmul.f32 %v764_v53, %v759_v23  ;;  %1090 = vperm.xlu1 %1587, %v2394_v2   ;;  %v2765_v23 = vld [vmem:[#allocation6_spill] sm:$0xff] }
 0x198   :  { %v772_v31 = vadd.f32 %v768_v6, %v744_v48  ;;  %v139_v48 = vmul.f32 %v2041_v29, %v2765_v23 }
 0x19a   :  { %1094 = vperm.xlu1 %1587, %v2424_v5   ;;  %v779_v61 = vpop.permute.xlu1 %778  ;;  %v800_v44 = vadd.f32 %v796_v55, %v772_v31  ;;  %v2766_v31 = vld [vmem:[#allocation7_spill] sm:$0xff]  ;;  %v2767_v55 = vmov 24  }
 0x19b   :  { %v794_v27 = vmul.f32 %v792_v12, %v779_v61  ;;  %v167_v19 = vmul.f32 %v2061_v56, %v2766_v31  ;;  %v2787_v31 = vld [vmem:[#allocation43_spill] sm:$0xff] }
 0x19d   :  { %v798_v58 = vadd.f32 %v794_v27, %v770_v50  ;;  %v1459_v50 = vld [vmem:[%s2625_s5 + $0x10] sm:$0xff] }
 0x19e   :  { %1590 = vset.pattern.permute.xlu1 %v2758_v49  ;;  %v783_v43 = vpop.permute.xlu1 %782  ;;  %1473 = vperm.xlu0 %1618, %v1459_v50  }
 0x19f   :  { %v795_v57 = vmul.f32 %v792_v12, %v783_v43  ;;  %1114 = vperm.xlu1 %1590, %v2438_v34   ;;  %v826_v0 = vadd.f32 %v2318_v39, %v798_v58  ;;  %v2768_v58 = vld [vmem:[#allocation9_spill] sm:$0xff] }
 0x1a0   :  { %v195_v49 = vmul.f32 %v2070_v51, %v2768_v58 }
 0x1a1   :  { %v799_v53 = vadd.f32 %v795_v57, %v771_v41  ;;  %v2769_v57 = vld [vmem:[#allocation11_spill] sm:$0xff] }
 0x1a3   :  { %1118 = vperm.xlu1 %1590, %v2394_v2   ;;  %v803_v14 = vpop.permute.xlu1 %802 }
 0x1a4   :  { %v821_v1 = vmul.f32 %v2298_v33, %v803_v14  ;;  %v2770_v14 = vld [vmem:[#allocation13_spill] sm:$0xff] }
 0x1a6   :  { %v825_v12 = vadd.f32 %v821_v1, %v797_v47  ;;  %v2764_v47 = vld [vmem:[#allocation25_spill] sm:$0xff]  ;;  %v251_v1 = vmul.f32 %v2096_v62, %v2770_v14 }
 0x1a7   :  { %1591 = vset.pattern.permute.xlu1 %v2759_v7  ;;  %v811_v45 = vpop.permute.xlu1 %810  ;;  %v2772_v7 = vld [vmem:[#allocation30_spill] sm:$0xff] }
 0x1a8   :  { %v823_v39 = vmul.f32 %v2298_v33, %v811_v45  ;;  %1138 = vperm.xlu1 %1591, %v2404_v42   ;;  %v853_v17 = vadd.f32 %v2322_v24, %v825_v12  ;;  %v2771_v12 = vld [vmem:[#allocation16_spill] sm:$0xff] }
 0x1a9   :  { %v279_v45 = vmul.f32 %v2772_v7, %v2771_v12 }
 0x1aa   :  { %v827_v36 = vadd.f32 %v823_v39, %v799_v53  ;;  %v2773_v39 = vld [vmem:[#allocation50_spill] sm:$0xff] }
 0x1ab   :  { %v815_v10 = vpop.permute.xlu1 %814 }
 0x1ac   :  { %v824_v26 = vmul.f32 %v2298_v33, %v815_v10  ;;  %1146 = vperm.xlu1 %1591, %v2394_v2   ;;  %v2775_v10 = vld [vmem:[#allocation31_spill] sm:$0xff] }
 0x1ae   :  { %v828_v46 = vadd.f32 %v824_v26, %v800_v44  ;;  %v2776_v26 = vld [vmem:[#allocation49_spill] sm:$0xff] }
 0x1b0   :  { %1150 = vperm.xlu1 %1591, %v2424_v5   ;;  %v835_v30 = vpop.permute.xlu1 %834  ;;  %v856_v28 = vadd.f32 %v2334_v35, %v828_v46  ;;  %v2763_v35 = vld [vmem:[#allocation4_spill] sm:$0xff] }
 0x1b1   :  { %v850_v38 = vmul.f32 %v2302_v20, %v835_v30  ;;  %v111_v41 = vmul.f32 %v2764_v47, %v2763_v35 }
 0x1b3   :  { %v854_v25 = vadd.f32 %v850_v38, %v826_v0  ;;  %v223_v0 = vmul.f32 %v2088_v40, %v2769_v57  ;;  %v2777_v38 = vld [vmem:[#allocation20_spill] sm:$0xff]  ;;  %v2791_v57 = vld [vmem:[#allocation42_spill] sm:$0xff] }
 0x1b4   :  { %1594 = vset.pattern.permute.xlu1 %v2760_v8  ;;  %v839_v60 = vpop.permute.xlu1 %838  ;;  %v2779_v8 = vmov 25  }
 0x1b5   :  { %v851_v24 = vmul.f32 %v2302_v20, %v839_v60  ;;  %1170 = vperm.xlu1 %1594, %v2438_v34   ;;  %v882_v33 = vadd.f32 %v2340_v52, %v854_v25  ;;  %v87_v20 = vadd.f32 %v83_v63, %v59_v11  ;;  %v2778_v25 = vld [vmem:[#allocation33_spill] sm:$0xff]  ;;  %v2781_v63 = vld [vmem:[#allocation34_spill] sm:$0xff]  ;;  %v2782_v11 = vld [vmem:[#allocation44_spill] sm:$0xff] }
 0x1b6   :  { %v335_v62 = vmul.f32 %v2778_v25, %v2777_v38 }
 0x1b7   :  { %v855_v4 = vadd.f32 %v851_v24, %v827_v36  ;;  %v115_v6 = vadd.f32 %v111_v41, %v87_v20  ;;  %v2774_v36 = vld [vmem:[#allocation18_spill] sm:$0xff]  ;;  %v2783_v41 = vld [vmem:[#allocation29_spill] sm:$0xff] }
 0x1b9   :  { %1174 = vperm.xlu1 %1594, %v2394_v2   ;;  %v859_v32 = vpop.permute.xlu1 %858  ;;  %v143_v27 = vadd.f32 %v139_v48, %v115_v6  ;;  %v2786_v48 = vld [vmem:[#allocation39_spill] sm:$0xff] }
 0x1ba   :  { %v877_v9 = vmul.f32 %v2306_v3, %v859_v32  ;;  %v2784_v32 = vld [vmem:[#allocation36_spill] sm:$0xff] }
 0x1bb   :  { %v171_v29 = vadd.f32 %v167_v19, %v143_v27 }
 0x1bc   :  { %v881_v52 = vadd.f32 %v877_v9, %v853_v17  ;;  %v391_v9 = vmul.f32 %v2784_v32, %v2783_v41 }
 0x1bd   :  { %1595 = vset.pattern.permute.xlu1 %v2767_v55  ;;  %v867_v18 = vpop.permute.xlu1 %866  ;;  %v199_v13 = vadd.f32 %v195_v49, %v171_v29  ;;  %v2790_v29 = vld [vmem:[#allocation37_spill] sm:$0xff] }
 0x1be   :  { %v879_v61 = vmul.f32 %v2306_v3, %v867_v18  ;;  %1194 = vperm.xlu1 %1595, %v2404_v42   ;;  %v909_v44 = vadd.f32 %v2364_v21, %v881_v52  ;;  %v2788_v18 = vld [vmem:[#allocation35_spill] sm:$0xff] }
 0x1bf   :  { %v227_v21 = vadd.f32 %v223_v0, %v199_v13  ;;  %v475_v0 = vmul.f32 %v2791_v57, %v2790_v29  ;;  %v2793_v13 = vld [vmem:[#allocation47_spill] sm:$0xff] }
 0x1c0   :  { %v883_v43 = vadd.f32 %v879_v61, %v855_v4  ;;  %v363_v4 = vmul.f32 %v2781_v63, %v2780_v59  ;;  %v2789_v61 = vld [vmem:[#allocation41_spill] sm:$0xff]  ;;  %v2798_v59 = vmov 28  }
 0x1c1   :  { %v871_v53 = vpop.permute.xlu1 %870  ;;  %v255_v40 = vadd.f32 %v251_v1, %v227_v21  ;;  %v447_v27 = vmul.f32 %v2789_v61, %v2788_v18 }
 0x1c2   :  { %v880_v56 = vmul.f32 %v2306_v3, %v871_v53  ;;  %1202 = vperm.xlu1 %1595, %v2394_v2   ;;  %v307_v3 = vmul.f32 %v2775_v10, %v2774_v36  ;;  %v2792_v53 = vmov 26  }
 0x1c3   :  { %v283_v30 = vadd.f32 %v279_v45, %v255_v40  ;;  %v2795_v40 = vld [vmem:[#allocation48_spill] sm:$0xff] }
 0x1c4   :  { %v884_v50 = vadd.f32 %v880_v56, %v856_v28 }
 0x1c5   :  { %v311_v24 = vadd.f32 %v307_v3, %v283_v30  ;;  %v2796_v3 = vld [vmem:[#allocation46_spill] sm:$0xff]  ;;  %v2797_v30 = vmov 27  }
 0x1c6   :  { %1206 = vperm.xlu1 %1595, %v2424_v5   ;;  %v891_v51 = vpop.permute.xlu1 %890  ;;  %v912_v17 = vadd.f32 %v2773_v39, %v884_v50 }
 0x1c7   :  { %v906_v46 = vmul.f32 %v2776_v26, %v891_v51  ;;  %v339_v47 = vadd.f32 %v335_v62, %v311_v24 }
 0x1c9   :  { %v910_v28 = vadd.f32 %v906_v46, %v882_v33  ;;  %v367_v23 = vadd.f32 %v363_v4, %v339_v47  ;;  %v2785_v33 = vld [vmem:[#allocation32_spill] sm:$0xff] }
 0x1ca   :  { %1598 = vset.pattern.permute.xlu1 %v2779_v8  ;;  %v895_v60 = vpop.permute.xlu1 %894  ;;  %v419_v52 = vmul.f32 %v2786_v48, %v2785_v33 }
 0x1cb   :  { %v907_v15 = vmul.f32 %v2776_v26, %v895_v60  ;;  %1226 = vperm.xlu1 %1598, %v2438_v34   ;;  %v938_v35 = vadd.f32 %v2782_v11, %v910_v28  ;;  %v395_v55 = vadd.f32 %v391_v9, %v367_v23 }
 0x1cd   :  { %v911_v20 = vadd.f32 %v907_v15, %v883_v43  ;;  %v423_v49 = vadd.f32 %v419_v52, %v395_v55  ;;  %v975_v15 = vpop.permute.xlu0 %974  ;;  %v2799_v52 = vmov 29  }
 0x1cf   :  { %1230 = vperm.xlu1 %1598, %v2394_v2   ;;  %v915_v6 = vpop.permute.xlu1 %914  ;;  %v451_v1 = vadd.f32 %v447_v27, %v423_v49  ;;  %v2800_v27 = vld [vmem:[#allocation22_spill] sm:$0xff] }
 0x1d0   :  { %v933_v19 = vmul.f32 %v2787_v31, %v915_v6 }
 0x1d1   :  { %v479_v21 = vadd.f32 %v475_v0, %v451_v1  ;;  %v2801_v1 = vmov 30  }
 0x1d2   :  { %v937_v58 = vadd.f32 %v933_v19, %v909_v44  ;;  %v2794_v44 = vld [vmem:[#allocation38_spill] sm:$0xff] }
 0x1d3   :  { %1599 = vset.pattern.permute.xlu1 %v2792_v53  ;;  %v923_v43 = vpop.permute.xlu1 %922  ;;  %v507_v45 = vadd.f32 %v2794_v44, %v479_v21 }
 0x1d4   :  { %v935_v56 = vmul.f32 %v2787_v31, %v923_v43  ;;  %1250 = vperm.xlu1 %1599, %v2404_v42   ;;  %v965_v14 = vadd.f32 %v2793_v13, %v937_v58 }
 0x1d5   :  { %v515_v10 = vmul.f32 0.01, %v507_v45  ;;  %vm511_vm2 = vcmp.gt.f32.partialorder %v507_v45, 0.0 }
 0x1d6   :  { %v939_v50 = vadd.f32 %v935_v56, %v911_v20  ;;  %v999_v20 = vpop.permute.xlu0 %998 }
 0x1d7   :  { %v927_v12 = vpop.permute.xlu1 %926  ;;  %v2540_v25 = vsel %vm511_vm2, %v507_v45, %v515_v10 }
 0x1d8   :  { %v936_v7 = vmul.f32 %v2787_v31, %v927_v12  ;;  %1258 = vperm.xlu1 %1599, %v2394_v2   ;;  %v988_v28 = vrot.slane %v2540_v25, %v1997_v16  ;;  %v1016_v9 = vrot.slane %v2540_v25, %v1999_v22  ;;  %v1044_v58 = vrot.slane %v2540_v25, %v2800_v27 }
 0x1da   :  { %v940_v51 = vadd.f32 %v936_v7, %v912_v17  ;;  %v990_v32 = vmul.f32 %v988_v28, %v975_v15  ;;  %v1011_v55 = vpop.permute.xlu0 %1010  ;;  %v1017_v61 = vmul.f32 %v1016_v9, %v999_v20  ;;  %v2805_v20 = vmov 0  }
 0x1db   :  { %v1020_v13 = vmul.f32 %v1016_v9, %v1011_v55 }
 0x1dc   :  { %1262 = vperm.xlu1 %1599, %v2424_v5   ;;  %v947_v39 = vpop.permute.xlu1 %946  ;;  %v968_v36 = vadd.f32 %v2795_v40, %v940_v51  ;;  %v2802_v51 = vld [vmem:[#allocation23_spill] sm:$0xff] }
 0x1dd   :  { %v962_v26 = vmul.f32 %v2796_v3, %v947_v39  ;;  %v1072_v39 = vrot.slane %v2540_v25, %v2802_v51 }
 0x1de   :  { %v1031_v0 = vpop.permute.xlu0 %1030 }
 0x1df   :  { %v966_v46 = vadd.f32 %v962_v26, %v938_v35  ;;  %v1046_v45 = vmul.f32 %v1044_v58, %v1031_v0 }
 0x1e0   :  { %1602 = vset.pattern.permute.xlu1 %v2797_v30  ;;  %v951_v38 = vpop.permute.xlu1 %950 }
 0x1e1   :  { %v963_v62 = vmul.f32 %v2796_v3, %v951_v38  ;;  %1282 = vperm.xlu1 %1602, %v2438_v34   ;;  %v994_v33 = vadd.f32 %v990_v32, %v966_v46  ;;  %v2803_v46 = vmov 31  }
 0x1e2   :  { %v1055_v21 = vpop.permute.xlu0 %1054 }
 0x1e3   :  { %v967_v17 = vadd.f32 %v963_v62, %v939_v50  ;;  %v1073_v62 = vmul.f32 %v1072_v39, %v1055_v21  ;;  %v2808_v21 = vld [vmem:[#allocation40_spill] sm:$0xff] }
 0x1e5   :  { %1286 = vperm.xlu1 %1602, %v2394_v2   ;;  %v971_v8 = vpop.permute.xlu1 %970 }
 0x1e6   :  { %v989_v60 = vmul.f32 %v988_v28, %v971_v8  ;;  %v1067_v3 = vpop.permute.xlu0 %1066 }
 0x1e8   :  { %v993_v24 = vadd.f32 %v989_v60, %v965_v14 }
 0x1e9   :  { %1604 = vset.pattern.permute.xlu1 %v2798_v59  ;;  %v979_v63 = vpop.permute.xlu1 %978 }
 0x1ea   :  { %v991_v4 = vmul.f32 %v988_v28, %v979_v63  ;;  %1310 = vperm.xlu1 %1604, %v2438_v34   ;;  %v1021_v29 = vadd.f32 %v1017_v61, %v993_v24 }
 0x1ec   :  { %v995_v11 = vadd.f32 %v991_v4, %v967_v17  ;;  %v1087_v17 = vpop.permute.xlu0 %1086 }
 0x1ed   :  { %v983_v35 = vpop.permute.xlu1 %982 }
 0x1ee   :  { %v992_v47 = vmul.f32 %v988_v28, %v983_v35  ;;  %1605 = vset.pattern.permute.xlu1 %v2797_v30  ;;  %v2804_v28 = vld [vmem:[#allocation27_spill] sm:$0xff] }
 0x1ef   :  { %1290 = vperm.xlu1 %1605, %v2424_v5   ;;  %v1100_v8 = vrot.slane %v2540_v25, %v2804_v28 }
 0x1f0   :  { %v996_v41 = vadd.f32 %v992_v47, %v968_v36  ;;  %v1111_v15 = vpop.permute.xlu0 %1110 }
 0x1f2   :  { %v1003_v23 = vpop.permute.xlu1 %1002  ;;  %v1024_v12 = vadd.f32 %v1020_v13, %v996_v41  ;;  %v1417_v41 = vld [vmem:[%s2624_s4] sm:$0xff] }
 0x1f3   :  { %v1018_v48 = vmul.f32 %v1016_v9, %v1003_v23  ;;  %1606 = vset.pattern.permute.xlu1 %v2799_v52 }
 0x1f4   :  { %1334 = vperm.xlu1 %1606, %v2404_v42  }
 0x1f5   :  { %v1022_v6 = vadd.f32 %v1018_v48, %v994_v33  ;;  %v1102_v33 = vmul.f32 %v1100_v8, %v1087_v17  ;;  %v2806_v48 = vld [vmem:[#allocation28_spill] sm:$0xff] }
 0x1f6   :  { %v1007_v31 = vpop.permute.xlu1 %1006 }
 0x1f7   :  { %v1019_v19 = vmul.f32 %v1016_v9, %v1007_v31  ;;  %v1050_v36 = vadd.f32 %v1046_v45, %v1022_v6 }
 0x1f8   :  { %1608 = vset.pattern.permute.xlu1 %v2798_v59 }
 0x1f9   :  { %v1023_v18 = vadd.f32 %v1019_v19, %v995_v11  ;;  %1318 = vperm.xlu1 %1608, %v2424_v5  }
 0x1fb   :  { %v1027_v49 = vpop.permute.xlu1 %1026 }
 0x1fc   :  { %v1045_v57 = vmul.f32 %v1044_v58, %v1027_v49 }
 0x1fd   :  { %1609 = vset.pattern.permute.xlu1 %v2799_v52 }
 0x1fe   :  { %v1049_v53 = vadd.f32 %v1045_v57, %v1021_v29  ;;  %1342 = vperm.xlu1 %1609, %v2394_v2   ;;  %v1458_v57 = vld [vmem:[%s2625_s5 + $0x8] sm:$0xff] }
 0x1ff   :  { %v1035_v43 = vpop.permute.xlu1 %1034 }
 0x200   :  { %v1047_v56 = vmul.f32 %v1044_v58, %v1035_v43  ;;  %v1077_v24 = vadd.f32 %v1073_v62, %v1049_v53  ;;  %v1156_v53 = vrot.slane %v2540_v25, %v2072_v54  ;;  %v1184_v62 = vrot.slane %v2540_v25, %v2075_v37 }
 0x202   :  { %v1051_v14 = vadd.f32 %v1047_v56, %v1023_v18  ;;  %1611 = vset.pattern.permute.xlu1 %v2801_v1  ;;  %v1420_v18 = vld [vmem:[%s2624_s4 + $0x18] sm:$0xff] }
 0x203   :  { %1366 = vperm.xlu1 %1611, %v2438_v34   ;;  %v1039_v50 = vpop.permute.xlu1 %1038 }
 0x204   :  { %v1048_v7 = vmul.f32 %v1044_v58, %v1039_v50  ;;  %v2807_v50 = vld [vmem:[#allocation45_spill] sm:$0xff] }
 0x206   :  { %v1052_v44 = vadd.f32 %v1048_v7, %v1024_v12  ;;  %v508_v12 = vadd.f32 %v2808_v21, %v2807_v50 }
 0x207   :  { %1612 = vset.pattern.permute.xlu1 %v2799_v52  ;;  %v1128_v52 = vrot.slane %v2540_v25, %v2806_v48 }
 0x208   :  { %1346 = vperm.xlu1 %1612, %v2424_v5   ;;  %v1059_v40 = vpop.permute.xlu1 %1058  ;;  %vm512_vm3 = vcmp.gt.f32.partialorder %v508_v12, 0.0 }
 0x209   :  { %v1074_v10 = vmul.f32 %v1072_v39, %v1059_v40  ;;  %v1129_v0 = vmul.f32 %v1128_v52, %v1111_v15 }
 0x20b   :  { %v1078_v26 = vadd.f32 %v1074_v10, %v1050_v36 }
 0x20c   :  { %1613 = vset.pattern.permute.xlu1 %v2803_v46  ;;  %v1063_v34 = vpop.permute.xlu1 %1062 }
 0x20d   :  { %v1075_v30 = vmul.f32 %v1072_v39, %v1063_v34  ;;  %1390 = vperm.xlu1 %1613, %v2404_v42   ;;  %v1076_v42 = vmul.f32 %v1072_v39, %v1067_v3  ;;  %v1106_v31 = vadd.f32 %v1102_v33, %v1078_v26  ;;  %v516_v39 = vmul.f32 0.01, %v508_v12 }
 0x20f   :  { %v1079_v38 = vadd.f32 %v1075_v30, %v1051_v14  ;;  %v1080_v32 = vadd.f32 %v1076_v42, %v1052_v44  ;;  %v2597_v34 = vsel %vm512_vm3, %v508_v12, %v516_v39 }
 0x210   :  { %v1296_v12 = vrot.slane %v2597_v34, %v2802_v51  ;;  %v1324_v39 = vrot.slane %v2597_v34, %v2804_v28 }
 0x211   :  { %1615 = vset.pattern.permute.xlu1 %v2801_v1  ;;  %v1083_v60 = vpop.permute.xlu1 %1082  ;;  %v1460_v1 = vld [vmem:[%s2625_s5 + $0x18] sm:$0xff] }
 0x212   :  { %v1101_v59 = vmul.f32 %v1100_v8, %v1083_v60  ;;  %1374 = vperm.xlu1 %1615, %v2424_v5   ;;  %v1123_v5 = vpop.permute.xlu0 %1122  ;;  %v1212_v60 = vrot.slane %v2597_v34, %v1997_v16 }
 0x213   :  { %v1132_v40 = vmul.f32 %v1128_v52, %v1123_v5 }
 0x214   :  { %v1105_v63 = vadd.f32 %v1101_v59, %v1077_v24 }
 0x215   :  { %v1091_v4 = vpop.permute.xlu1 %1090 }
 0x216   :  { %v1103_v11 = vmul.f32 %v1100_v8, %v1091_v4  ;;  %1616 = vset.pattern.permute.xlu1 %v2803_v46  ;;  %v1143_v61 = vpop.permute.xlu0 %1142  ;;  %v1133_v13 = vadd.f32 %v1129_v0, %v1105_v63 }
 0x217   :  { %1398 = vperm.xlu1 %1616, %v2394_v2   ;;  %v1419_v2 = vld [vmem:[%s2624_s4 + $0x10] sm:$0xff] }
 0x218   :  { %v1107_v35 = vadd.f32 %v1103_v11, %v1079_v38  ;;  %v1158_v38 = vmul.f32 %v1156_v53, %v1143_v61 }
 0x219   :  { %v1095_v47 = vpop.permute.xlu1 %1094 }
 0x21a   :  { %v1104_v9 = vmul.f32 %v1100_v8, %v1095_v47  ;;  %v1167_v56 = vpop.permute.xlu0 %1166 }
 0x21b   :  { %1617 = vset.pattern.permute.xlu1 %v2805_v20  ;;  %v1185_v47 = vmul.f32 %v1184_v62, %v1167_v56 }
 0x21c   :  { %v1108_v23 = vadd.f32 %v1104_v9, %v1080_v32  ;;  %1423 = vperm.xlu1 %1617, %v1417_v41   ;;  %v1240_v9 = vrot.slane %v2597_v34, %v1999_v22  ;;  %v1268_v22 = vrot.slane %v2597_v34, %v2800_v27 }
 0x21e   :  { %v1115_v6 = vpop.permute.xlu1 %1114  ;;  %v1179_v36 = vpop.permute.xlu0 %1178  ;;  %v1136_v26 = vadd.f32 %v1132_v40, %v1108_v23 }
 0x21f   :  { %v1130_v19 = vmul.f32 %v1128_v52, %v1115_v6  ;;  %v1188_v6 = vmul.f32 %v1184_v62, %v1179_v36 }
 0x220   :  { %1433 = vperm.xlu1 %1617, %v1419_v2  }
 0x221   :  { %v1134_v55 = vadd.f32 %v1130_v19, %v1106_v31 }
 0x222   :  { %v1119_v58 = vpop.permute.xlu1 %1118  ;;  %v1199_v17 = vpop.permute.xlu0 %1198 }
 0x223   :  { %v1131_v49 = vmul.f32 %v1128_v52, %v1119_v58  ;;  %v1162_v24 = vadd.f32 %v1158_v38, %v1134_v55  ;;  %v1214_v63 = vmul.f32 %v1212_v60, %v1199_v17 }
 0x224   :  { %1438 = vperm.xlu1 %1617, %v1420_v18  }
 0x225   :  { %v1135_v29 = vadd.f32 %v1131_v49, %v1107_v35 }
 0x226   :  { %v1223_v41 = vpop.permute.xlu0 %1222 }
 0x227   :  { %v1139_v43 = vpop.permute.xlu1 %1138  ;;  %v1241_v5 = vmul.f32 %v1240_v9, %v1223_v41 }
 0x228   :  { %v1157_v14 = vmul.f32 %v1156_v53, %v1139_v43  ;;  %1468 = vperm.xlu1 %1617, %v1458_v57  }
 0x22a   :  { %v1161_v7 = vadd.f32 %v1157_v14, %v1133_v13  ;;  %v1235_v2 = vpop.permute.xlu0 %1234 }
 0x22b   :  { %v1147_v44 = vpop.permute.xlu1 %1146  ;;  %v1244_v61 = vmul.f32 %v1240_v9, %v1235_v2 }
 0x22c   :  { %v1159_v45 = vmul.f32 %v1156_v53, %v1147_v44  ;;  %1478 = vperm.xlu1 %1617, %v1460_v1   ;;  %v1189_v25 = vadd.f32 %v1185_v47, %v1161_v7 }
 0x22e   :  { %v1163_v10 = vadd.f32 %v1159_v45, %v1135_v29  ;;  %v1255_v49 = vpop.permute.xlu0 %1254 }
 0x22f   :  { %v1151_v3 = vpop.permute.xlu1 %1150 }
 0x230   :  { %v1160_v46 = vmul.f32 %v1156_v53, %v1151_v3  ;;  %v1270_v53 = vmul.f32 %v1268_v22, %v1255_v49 }
 0x232   :  { %v1164_v30 = vadd.f32 %v1160_v46, %v1136_v26  ;;  %v1279_v13 = vpop.permute.xlu0 %1278 }
 0x233   :  { %v1297_v45 = vmul.f32 %v1296_v12, %v1279_v13 }
 0x234   :  { %v1171_v8 = vpop.permute.xlu1 %1170  ;;  %v1192_v55 = vadd.f32 %v1188_v6, %v1164_v30 }
 0x235   :  { %v1186_v59 = vmul.f32 %v1184_v62, %v1171_v8 }
 0x236   :  { %v1307_v44 = vpop.permute.xlu0 %1306 }
 0x237   :  { %v1190_v4 = vadd.f32 %v1186_v59, %v1162_v24  ;;  %v1325_v36 = vmul.f32 %v1324_v39, %v1307_v44 }
 0x238   :  { %v1175_v15 = vpop.permute.xlu1 %1174 }
 0x239   :  { %v1187_v11 = vmul.f32 %v1184_v62, %v1175_v15  ;;  %v1218_v42 = vadd.f32 %v1214_v63, %v1190_v4 }
 0x23b   :  { %v1191_v35 = vadd.f32 %v1187_v11, %v1163_v10 }
 0x23d   :  { %v1195_v32 = vpop.permute.xlu1 %1194 }
 0x23e   :  { %v1213_v20 = vmul.f32 %v1212_v60, %v1195_v32 }
 0x240   :  { %v1217_v23 = vadd.f32 %v1213_v20, %v1189_v25 }
 0x241   :  { %v1203_v33 = vpop.permute.xlu1 %1202 }
 0x242   :  { %v1215_v16 = vmul.f32 %v1212_v60, %v1203_v33  ;;  %v1245_v52 = vadd.f32 %v1241_v5, %v1217_v23  ;;  %v1380_v33 = vrot.slane %v2597_v34, %v2072_v54 }
 0x244   :  { %v1219_v31 = vadd.f32 %v1215_v16, %v1191_v35 }
 0x245   :  { %v1207_v19 = vpop.permute.xlu1 %1206 }
 0x246   :  { %v1216_v18 = vmul.f32 %v1212_v60, %v1207_v19  ;;  %v1315_v60 = vpop.permute.xlu0 %1314 }
 0x247   :  { %v1327_v63 = vmul.f32 %v1324_v39, %v1315_v60 }
 0x248   :  { %v1220_v58 = vadd.f32 %v1216_v18, %v1192_v55 }
 0x24a   :  { %v1227_v29 = vpop.permute.xlu1 %1226  ;;  %v1248_v57 = vadd.f32 %v1244_v61, %v1220_v58  ;;  %v1339_v15 = vpop.permute.xlu0 %1338 }
 0x24b   :  { %v1242_v0 = vmul.f32 %v1240_v9, %v1227_v29 }
 0x24d   :  { %v1246_v43 = vadd.f32 %v1242_v0, %v1218_v42  ;;  %v1352_v42 = vrot.slane %v2597_v34, %v2806_v48  ;;  %v1408_v0 = vrot.slane %v2597_v34, %v2075_v37 }
 0x24e   :  { %v1231_v56 = vpop.permute.xlu1 %1230  ;;  %v1363_v5 = vpop.permute.xlu0 %1362 }
 0x24f   :  { %v1243_v14 = vmul.f32 %v1240_v9, %v1231_v56  ;;  %v1274_v1 = vadd.f32 %v1270_v53, %v1246_v43  ;;  %v1354_v47 = vmul.f32 %v1352_v42, %v1339_v15 }
 0x251   :  { %v1247_v50 = vadd.f32 %v1243_v14, %v1219_v31 }
 0x252   :  { %v1371_v48 = vpop.permute.xlu0 %1370 }
 0x253   :  { %v1251_v21 = vpop.permute.xlu1 %1250  ;;  %v1383_v58 = vmul.f32 %v1380_v33, %v1371_v48 }
 0x254   :  { %v1269_v7 = vmul.f32 %v1268_v22, %v1251_v21 }
 0x256   :  { %v1273_v40 = vadd.f32 %v1269_v7, %v1245_v52  ;;  %v1381_v52 = vmul.f32 %v1380_v33, %v1363_v5  ;;  %v1395_v29 = vpop.permute.xlu0 %1394 }
 0x257   :  { %v1259_v27 = vpop.permute.xlu1 %1258  ;;  %v1410_v54 = vmul.f32 %v1408_v0, %v1395_v29 }
 0x258   :  { %v1301_v10 = vadd.f32 %v1297_v45, %v1273_v40  ;;  %v1271_v3 = vmul.f32 %v1268_v22, %v1259_v27 }
 0x25a   :  { %v1275_v26 = vadd.f32 %v1271_v3, %v1247_v50  ;;  %v1329_v46 = vadd.f32 %v1325_v36, %v1301_v10  ;;  %v1403_v7 = vpop.permute.xlu0 %1402 }
 0x25b   :  { %v1263_v30 = vpop.permute.xlu1 %1262 }
 0x25c   :  { %v1272_v38 = vmul.f32 %v1268_v22, %v1263_v30 }
 0x25e   :  { %v1276_v62 = vadd.f32 %v1272_v38, %v1248_v57  ;;  %v1429_v34 = vpop.permute.xlu0 %1428 }
 0x260   :  { %v1283_v17 = vpop.permute.xlu1 %1282 }
 0x261   :  { %v1298_v8 = vmul.f32 %v1296_v12, %v1283_v17 }
 0x263   :  { %v1302_v51 = vadd.f32 %v1298_v8, %v1274_v1  ;;  %v1464_v8 = vpop.permute.xlu0 %1463 }
 0x264   :  { %v1287_v24 = vpop.permute.xlu1 %1286 }
 0x265   :  { %v1299_v59 = vmul.f32 %v1296_v12, %v1287_v24 }
 0x267   :  { %v1303_v4 = vadd.f32 %v1299_v59, %v1275_v26 }
 0x269   :  { %v1311_v28 = vpop.permute.xlu1 %1310  ;;  %v1331_v11 = vadd.f32 %v1327_v63, %v1303_v4 }
 0x26a   :  { %v1326_v35 = vmul.f32 %v1324_v39, %v1311_v28 }
 0x26c   :  { %v1330_v41 = vadd.f32 %v1326_v35, %v1302_v51  ;;  %v1474_v35 = vpop.permute.xlu0 %1473 }
 0x26e   :  { %v1291_v32 = vpop.permute.xlu1 %1290  ;;  %v1358_v9 = vadd.f32 %v1354_v47, %v1330_v41 }
 0x26f   :  { %v1300_v25 = vmul.f32 %v1296_v12, %v1291_v32 }
 0x271   :  { %v1304_v20 = vadd.f32 %v1300_v25, %v1276_v62 }
 0x273   :  { %v1335_v23 = vpop.permute.xlu1 %1334 }
 0x274   :  { %v1353_v16 = vmul.f32 %v1352_v42, %v1335_v23 }
 0x276   :  { %v1357_v2 = vadd.f32 %v1353_v16, %v1329_v46 }
 0x278   :  { %v1319_v6 = vpop.permute.xlu1 %1318  ;;  %v1385_v31 = vadd.f32 %v1381_v52, %v1357_v2 }
 0x279   :  { %v1328_v19 = vmul.f32 %v1324_v39, %v1319_v6  ;;  %v1412_v39 = vmul.f32 %v1408_v0, %v1403_v7 }
 0x27b   :  { %v1332_v55 = vadd.f32 %v1328_v19, %v1304_v20 }
 0x27d   :  { %v1343_v18 = vpop.permute.xlu1 %1342 }
 0x27e   :  { %v1355_v61 = vmul.f32 %v1352_v42, %v1343_v18 }
 0x280   :  { %v1359_v49 = vadd.f32 %v1355_v61, %v1331_v11 }
 0x282   :  { %v1367_v57 = vpop.permute.xlu1 %1366  ;;  %v1387_v22 = vadd.f32 %v1383_v58, %v1359_v49 }
 0x283   :  { %v1382_v53 = vmul.f32 %v1380_v33, %v1367_v57 }
 0x285   :  { %v1386_v43 = vadd.f32 %v1382_v53, %v1358_v9 }
 0x287   :  { %v1347_v56 = vpop.permute.xlu1 %1346  ;;  %v1414_v13 = vadd.f32 %v1410_v54, %v1386_v43 }
 0x288   :  { %v1356_v14 = vmul.f32 %v1352_v42, %v1347_v56 }
 0x289   :  { %v1442_v46 = vadd.f32 %v1429_v34, %v1414_v13 }
 0x28a   :  { %v1360_v1 = vadd.f32 %v1356_v14, %v1332_v55 }
 0x28b   :  { %v1450_v17 = vmul.f32 0.01, %v1442_v46  ;;  %vm1446_vm6 = vcmp.gt.f32.partialorder %v1442_v46, 0.0 }
 0x28c   :  { %v1391_v50 = vpop.permute.xlu1 %1390 }
 0x28d   :  { %v1409_v21 = vmul.f32 %v1408_v0, %v1391_v50  ;;  %v1454_v28 = vsel %vm1446_vm6, %v1442_v46, %v1450_v17 }
 0x28f   :  { %v1413_v12 = vadd.f32 %v1409_v21, %v1385_v31 }
 0x291   :  { %v1375_v44 = vpop.permute.xlu1 %1374 }
 0x292   :  { %v1384_v45 = vmul.f32 %v1380_v33, %v1375_v44 }
 0x294   :  { %v1388_v40 = vadd.f32 %v1384_v45, %v1360_v1 }
 0x296   :  { %v1399_v27 = vpop.permute.xlu1 %1398  ;;  %v1416_v36 = vadd.f32 %v1412_v39, %v1388_v40 }
 0x297   :  { %v1411_v10 = vmul.f32 %v1408_v0, %v1399_v27 }
 0x299   :  { %v1415_v3 = vadd.f32 %v1411_v10, %v1387_v22 }
 0x29b   :  { %v1424_v37 = vpop.permute.xlu1 %1423 }
 0x29c   :  { %v1441_v26 = vadd.f32 %v1424_v37, %v1413_v12 }
 0x29e   :  { %v1449_v62 = vmul.f32 0.01, %v1441_v26  ;;  %vm1445_vm4 = vcmp.gt.f32.partialorder %v1441_v26, 0.0 }
 0x29f   :  { %v1434_v30 = vpop.permute.xlu1 %1433 }
 0x2a0   :  { %v1443_v38 = vadd.f32 %v1434_v30, %v1415_v3  ;;  %v1453_v59 = vsel %vm1445_vm4, %v1441_v26, %v1449_v62 }
 0x2a1   :  { %v1481_v11 = vmul.f32 %v1464_v8, %v1453_v59 }
 0x2a2   :  { %v1451_v60 = vmul.f32 0.01, %v1443_v38  ;;  %vm1447_vm5 = vcmp.gt.f32.partialorder %v1443_v38, 0.0 }
 0x2a3   :  { %v1439_v51 = vpop.permute.xlu1 %1438 }
 0x2a4   :  { %v1444_v24 = vadd.f32 %v1439_v51, %v1416_v36  ;;  %v1455_v63 = vsel %vm1447_vm5, %v1443_v38, %v1451_v60 }
 0x2a5   :  { %v1483_v47 = vmul.f32 %v1474_v35, %v1455_v63 }
 0x2a6   :  { %v1452_v4 = vmul.f32 0.01, %v1444_v24  ;;  %vm1448_vm7 = vcmp.gt.f32.partialorder %v1444_v24, 0.0 }
 0x2a7   :  { %v1469_v15 = vpop.permute.xlu1 %1468 }
 0x2a8   :  { %v1482_v42 = vmul.f32 %v1469_v15, %v1454_v28  ;;  %v1456_v9 = vsel %vm1448_vm7, %v1444_v24, %v1452_v4 }
 0x2aa   :  { %v1485_v41 = vadd.f32 %v1482_v42, %v1481_v11 }
 0x2ab   :  { %v1479_v32 = vpop.permute.xlu1 %1478 }
 0x2ac   :  { %v1484_v25 = vmul.f32 %v1479_v32, %v1456_v9  ;;  %v1486_v20 = vadd.f32 %v1485_v41, %v1483_v47 }
 0x2ae   :  { %v1487_v5 = vadd.f32 %v1486_v20, %v1484_v25 }
 0x2b0   :  { %v1488_v23 = vrot.slane %v1487_v5, 4 }
 0x2b2   :  { %v1489_v33 = vadd.f32 %v1488_v23, %v1487_v5 }
 0x2b4   :  { %v1490_v16 = vrot.slane %v1489_v33, 2 }
 0x2b6   :  { %v1491_v52 = vadd.f32 %v1490_v16, %v1489_v33 }
 0x2b8   :  { %v1492_v2 = vrot.slane %v1491_v52, 1 }
 0x2ba   :  { %v1493_v6 = vadd.f32 %v1492_v2, %v1491_v52 }
 0x2bc   :  { %1494 = vst [vmem:[%s2626_s6] sm:$0x1] %v1493_v6 }

</bundles_post_ra>
